<compile_context>
chip_gen: v7x
topology: tpu7x:2x2x1
jax: 0.10.0
libtpu: 0.0.40
codegen_flags: <defaults>
</compile_context>

<pallas_src>
import functools

import numpy as np
import jax
import jax.numpy as jnp
from jax import lax
from jax.experimental import pallas as pl
from jax.experimental.pallas import tpu as pltpu


# ----------------------------- Pallas kernel --------------------------------

def lstm_chunk_kernel(seq_ref, proj_ref, whh_ref, lens_ref,
                      out_ref, hn_ref, cn_ref,
                      gx_ref, h_ref, c_ref, *, unroll):
    """One Tc-step chunk of the masked-LSTM recurrence.

    seq_ref  : (Tc*B, 1)   int32 token ids for this chunk (row = t*B + b)
    proj_ref : (V_pad, 4H) f32  emb @ W_ih^T + (b_ih+b_hh), g-cols pre-scaled x2
    whh_ref  : (H, 4H)     f32  W_hh^T, g-cols pre-scaled x2
    lens_ref : (B, H)      int32 lens broadcast over H (matches h/c layout)
    out_ref  : (Tc, B, H)  f32  per-step hidden (0 on padded steps)
    hn_ref   : (1, B, H)   f32  final h (resident across chunks)
    cn_ref   : (1, B, H)   f32  final c
    gx_ref   : (Tc*B, 4H)  f32  VMEM scratch: gathered input projections
    h_ref/c_ref : (B, H)   f32  VMEM scratch: state carried across chunks
    """
    Tc, B, H = out_ref.shape
    V_pad = proj_ref.shape[0]
    chunk = pl.program_id(0)

    @pl.when(chunk == 0)
    def _():
        h_ref[...] = jnp.zeros_like(h_ref)
        c_ref[...] = jnp.zeros_like(c_ref)

    # ---- per-chunk embedding + input-projection gather (one MXU push, off
    # the serial path): onehot(ids) @ proj_table  ==  proj_table[ids] exactly.
    ids = seq_ref[...]                                            # (Tc*B, 1)
    iota_v = lax.broadcasted_iota(jnp.int32, (Tc * B, V_pad), 1)  # (Tc*B, V_pad)
    onehot = (iota_v == ids).astype(jnp.float32)
    gx_ref[...] = jnp.dot(onehot, proj_ref[...],
                          preferred_element_type=jnp.float32)     # (Tc*B, 4H)

    whh = whh_ref[...]            # (H, 4H), resident in vregs/VMEM
    lens = lens_ref[...]          # (B, H) int32
    base = chunk * Tc             # global time offset of this chunk

    h0 = h_ref[...]
    c0 = c_ref[...]

    def step(t, carry):
        h, c = carry
        row = pl.multiple_of(t * B, B)
        gx_t = gx_ref[pl.ds(row, B), :]                           # (B, 4H)
        gates = gx_t + jnp.dot(h, whh, preferred_element_type=jnp.float32)

        # One full-width (B, 4H) sigmoid on the EUP; the g gate is recovered
        # via tanh(x) = 2*sigmoid(2x) - 1 (g-columns were pre-scaled by 2).
        s = jax.nn.sigmoid(gates)
        i_g = s[:, 0 * H:1 * H]
        f_g = s[:, 1 * H:2 * H]
        g_g = 2.0 * s[:, 2 * H:3 * H] - 1.0
        o_g = s[:, 3 * H:4 * H]

        c_new = f_g * c + i_g * g_g
        h_new = o_g * jnp.tanh(c_new)

        valid = (base + t) < lens                                 # (B, H) bool
        c_upd = jnp.where(valid, c_new, c)
        h_upd = jnp.where(valid, h_new, h)

        out_ref[t] = jnp.where(valid, h_new, 0.0)                 # pad_packed -> 0
        return (h_upd, c_upd)

    h_fin, c_fin = lax.fori_loop(0, Tc, step, (h0, c0), unroll=unroll)

    # Persist state for the next chunk; final chunk's write is the result.
    h_ref[...] = h_fin
    c_ref[...] = c_fin
    hn_ref[0] = h_fin
    cn_ref[0] = c_fin


# ------------------------------- wrapper -------------------------------------

def encoder_forward(params, seqs, lens, *, chunk=8, unroll=8):
    """seqs: (T, B) int32 token ids; lens: python list of ints per batch elem."""
    emb_w = params["embedding"]                 # (V, E), row 3 (padding_idx) = 0
    w_ih = params["w_ih"]                       # (4H, E)
    w_hh = params["w_hh"]                       # (4H, H)
    bias = params["b_ih"] + params["b_hh"]      # (4H,)

    V = emb_w.shape[0]
    H = w_hh.shape[1]
    B = seqs.shape[1]

    # pack/pad truncates to max(lens); pad time up to a multiple of the chunk
    # (coarse bucketing -> fewer distinct compiled shapes).
    T_out = int(max(lens))
    Tc = chunk
    T_pad = ((T_out + Tc - 1) // Tc) * Tc
    n_chunks = T_pad // Tc

    seqs_used = seqs[:T_out].astype(jnp.int32)
    if T_pad > T_out:
        pad_blk = jnp.full((T_pad - T_out, B), 3, dtype=jnp.int32)  # padding_idx
        seqs_used = jnp.concatenate([seqs_used, pad_blk], axis=0)
    seqs_flat = seqs_used.reshape(T_pad * B, 1)                     # row = t*B + b

    # Fused embedding + input projection (+ summed biases) table; g-gate
    # columns pre-scaled by 2 (exact in FP) for the in-kernel one-sigmoid
    # trick. Padded to a 128-row multiple for the one-hot MXU gather.
    proj = emb_w @ w_ih.T + bias[None, :]                           # (V, 4H)
    whh_t = jnp.transpose(w_hh)                                     # (H, 4H)
    g_scale = jnp.ones((4 * H,), jnp.float32).at[2 * H:3 * H].set(2.0)
    proj = (proj * g_scale[None, :]).astype(jnp.float32)
    whh_t = (whh_t * g_scale[None, :]).astype(jnp.float32)
    V_pad = max(128, ((V + 127) // 128) * 128)
    proj_pad = jnp.zeros((V_pad, 4 * H), jnp.float32).at[:V].set(proj)

    lens_arr = jnp.asarray(lens, dtype=jnp.int32)
    lens_b = jnp.broadcast_to(lens_arr[:, None], (B, H)).astype(jnp.int32)

    cost = pl.CostEstimate(
        flops=int(2 * T_pad * B * H * 4 * H            # recurrent matmul
                  + 2 * T_pad * B * V_pad * 4 * H),    # one-hot gather matmul
        transcendentals=int(2 * T_pad * B * 4 * H),
        bytes_accessed=int(seqs_flat.size * 4 + proj_pad.size * 4
                           + whh_t.size * 4 + lens_b.size * 4
                           + T_pad * B * H * 4 + 2 * B * H * 4),
    )

    kernel = functools.partial(lstm_chunk_kernel, unroll=unroll)

    outputs, h_n, c_n = pl.pallas_call(
        kernel,
        out_shape=(
            jax.ShapeDtypeStruct((T_pad, B, H), jnp.float32),
            jax.ShapeDtypeStruct((1, B, H), jnp.float32),
            jax.ShapeDtypeStruct((1, B, H), jnp.float32),
        ),
        grid_spec=pltpu.PrefetchScalarGridSpec(
            num_scalar_prefetch=0,
            grid=(n_chunks,),
            in_specs=[
                pl.BlockSpec((Tc * B, 1), lambda c: (c, 0)),          # token ids
                pl.BlockSpec((V_pad, 4 * H), lambda c: (0, 0)),       # proj table
                pl.BlockSpec((H, 4 * H), lambda c: (0, 0)),           # W_hh^T
                pl.BlockSpec((B, H), lambda c: (0, 0)),               # lens
            ],
            out_specs=[
                pl.BlockSpec((Tc, B, H), lambda c: (c, 0, 0)),        # outputs
                pl.BlockSpec((1, B, H), lambda c: (0, 0, 0)),         # h_n
                pl.BlockSpec((1, B, H), lambda c: (0, 0, 0)),         # c_n
            ],
            scratch_shapes=[
                pltpu.VMEM((Tc * B, 4 * H), jnp.float32),             # gathered gx
                pltpu.VMEM((B, H), jnp.float32),                      # h carry
                pltpu.VMEM((B, H), jnp.float32),                      # c carry
            ],
        ),
        compiler_params=pltpu.CompilerParams(
            dimension_semantics=("arbitrary",),        # time recurrence is serial
            vmem_limit_bytes=32 * 1024 * 1024,
        ),
        cost_estimate=cost,
    )(seqs_flat, proj_pad, whh_t, lens_b)

    return outputs[:T_out], (h_n, c_n)


# --------------------------- pure-JAX reference ------------------------------

def encoder_reference(params, seqs, lens):
    emb = params["embedding"][seqs]
    T_out = int(max(lens))
    x = emb[:T_out]
    B = x.shape[1]
    w_ih, w_hh = params["w_ih"], params["w_hh"]
    b = params["b_ih"] + params["b_hh"]
    H = w_hh.shape[1]
    lens_arr = jnp.asarray(lens, dtype=jnp.int32)
    mask = (jnp.arange(T_out)[:, None] < lens_arr[None, :]).astype(jnp.float32)

    def step(carry, inp):
        h, c = carry
        x_t, m_t = inp
        gates = x_t @ w_ih.T + h @ w_hh.T + b
        i = jax.nn.sigmoid(gates[:, :H])
        f = jax.nn.sigmoid(gates[:, H:2 * H])
        g = jnp.tanh(gates[:, 2 * H:3 * H])
        o = jax.nn.sigmoid(gates[:, 3 * H:])
        c_new = f * c + i * g
        h_new = o * jnp.tanh(c_new)
        m = m_t[:, None]
        c2 = m * c_new + (1 - m) * c
        h2 = m * h_new + (1 - m) * h
        return (h2, c2), h_new * m

    init = (jnp.zeros((B, H), jnp.float32), jnp.zeros((B, H), jnp.float32))
    (h_n, c_n), outs = jax.lax.scan(step, init, (x, mask))
    return outs, (h_n[None], c_n[None])


# --------------------------------- main --------------------------------------

if __name__ == "__main__":
    VOCAB, EMB, HID = 50, 32, 32
    T, B = 12, 8
    lens = [12, 5, 9, 3, 12, 7, 1, 10]

    key = jax.random.PRNGKey(0)
    k_emb, k_wih, k_whh, k_bih, k_bhh, k_seq = jax.random.split(key, 6)

    bound = 1.0 / np.sqrt(HID)
    params = {
        # nn.Embedding: N(0,1), padding_idx=3 row zeroed
        "embedding": jax.random.normal(k_emb, (VOCAB, EMB), jnp.float32)
                        .at[3].set(0.0),
        # nn.LSTM: U(-1/sqrt(H), 1/sqrt(H)), gate order [i, f, g, o]
        "w_ih": jax.random.uniform(k_wih, (4 * HID, EMB), jnp.float32, -bound, bound),
        "w_hh": jax.random.uniform(k_whh, (4 * HID, HID), jnp.float32, -bound, bound),
        "b_ih": jax.random.uniform(k_bih, (4 * HID,), jnp.float32, -bound, bound),
        "b_hh": jax.random.uniform(k_bhh, (4 * HID,), jnp.float32, -bound, bound),
    }

    # Token ids (padding_idx=3 in the padded tail region).
    seqs = jax.random.randint(k_seq, (T, B), 0, VOCAB, dtype=jnp.int32)
    for b_i, L in enumerate(lens):
        seqs = seqs.at[L:, b_i].set(3)

    outputs, (h_n, c_n) = encoder_forward(params, seqs, lens)
    jax.block_until_ready((outputs, h_n, c_n))

    ref_out, (ref_h, ref_c) = encoder_reference(params, seqs, lens)
    np.testing.assert_allclose(np.asarray(outputs), np.asarray(ref_out),
                               rtol=1e-4, atol=1e-5)
    np.testing.assert_allclose(np.asarray(h_n), np.asarray(ref_h),
                               rtol=1e-4, atol=1e-5)
    np.testing.assert_allclose(np.asarray(c_n), np.asarray(ref_c),
                               rtol=1e-4, atol=1e-5)

    print("KERNEL_OK")
</pallas_src>

<mosaic_0001>
module attributes {stable_mosaic.version = 11 : i64} {
  func.func @lstm_chunk_kernel(%arg0: i32, %arg1: memref<64x1xi32, #tpu.memory_space<vmem>>, %arg2: memref<128x128xf32, #tpu.memory_space<vmem>>, %arg3: memref<32x128xf32, #tpu.memory_space<vmem>>, %arg4: memref<8x32xi32, #tpu.memory_space<vmem>>, %arg5: memref<8x8x32xf32, #tpu.memory_space<vmem>>, %arg6: memref<1x8x32xf32, #tpu.memory_space<vmem>>, %arg7: memref<1x8x32xf32, #tpu.memory_space<vmem>>, %arg8: memref<64x128xf32, #tpu.memory_space<vmem>>, %arg9: memref<8x32xf32, #tpu.memory_space<vmem>>, %arg10: memref<8x32xf32, #tpu.memory_space<vmem>>) attributes {dimension_semantics = [#tpu.dimension_semantics<arbitrary>], iteration_bounds = array<i64: 2>, scalar_prefetch = 0 : i64, scratch_operands = 3 : i64, tpu.core_type = #tpu.core_type<tc>, window_params = [{transform_indices = @transform_0, window_bounds = array<i64: 64, 1>}, {pipeline_mode = #tpu.pipeline_mode<synchronous>, transform_indices = @transform_1, window_bounds = array<i64: 128, 128>}, {pipeline_mode = #tpu.pipeline_mode<synchronous>, transform_indices = @transform_2, window_bounds = array<i64: 32, 128>}, {pipeline_mode = #tpu.pipeline_mode<synchronous>, transform_indices = @transform_3, window_bounds = array<i64: 8, 32>}, {transform_indices = @transform_4, window_bounds = array<i64: 8, 8, 32>}, {pipeline_mode = #tpu.pipeline_mode<synchronous>, transform_indices = @transform_5, window_bounds = array<i64: 1, 8, 32>}, {pipeline_mode = #tpu.pipeline_mode<synchronous>, transform_indices = @transform_6, window_bounds = array<i64: 1, 8, 32>}]} {
    %c0_i32 = arith.constant 0 : i32
    %0 = arith.cmpi eq, %arg0, %c0_i32 : i32
    %1 = arith.extui %0 : i1 to i32
    %c0_i32_0 = arith.constant 0 : i32
    %2 = arith.cmpi ne, %1, %c0_i32_0 : i32
    scf.if %2 {
      %cst_98 = arith.constant 0.000000e+00 : f32
      %305 = vector.broadcast %cst_98 : f32 to vector<8x32xf32>
      %c0_99 = arith.constant 0 : index
      %c0_100 = arith.constant 0 : index
      %306 = vector.load %arg9[%c0_99, %c0_100] : memref<8x32xf32, #tpu.memory_space<vmem>>, vector<8x32xf32>
      tpu.vector_store %arg9[%c0_99, %c0_100], %305 {strides = array<i32>} : memref<8x32xf32, #tpu.memory_space<vmem>>, vector<8x32xf32>,
      %cst_101 = arith.constant 0.000000e+00 : f32
      %307 = vector.broadcast %cst_101 : f32 to vector<8x32xf32>
      %c0_102 = arith.constant 0 : index
      %c0_103 = arith.constant 0 : index
      %308 = vector.load %arg10[%c0_102, %c0_103] : memref<8x32xf32, #tpu.memory_space<vmem>>, vector<8x32xf32>
      tpu.vector_store %arg10[%c0_102, %c0_103], %307 {strides = array<i32>} : memref<8x32xf32, #tpu.memory_space<vmem>>, vector<8x32xf32>,
    } else {
    }
    %c0 = arith.constant 0 : index
    %c0_1 = arith.constant 0 : index
    %3 = vector.load %arg1[%c0, %c0_1] : memref<64x1xi32, #tpu.memory_space<vmem>>, vector<64x1xi32>
    %4 = tpu.iota {dimensions = array<i32: 1>} : vector<64x128xi32>
    %5 = vector.broadcast %3 : vector<64x1xi32> to vector<64x128xi32>
    %6 = arith.cmpi eq, %4, %5 : vector<64x128xi32>
    %7 = arith.extui %6 : vector<64x128xi1> to vector<64x128xi32>
    %8 = arith.sitofp %7 : vector<64x128xi32> to vector<64x128xf32>
    %c0_2 = arith.constant 0 : index
    %c0_3 = arith.constant 0 : index
    %9 = vector.load %arg2[%c0_2, %c0_3] : memref<128x128xf32, #tpu.memory_space<vmem>>, vector<128x128xf32>
    %cst = arith.constant dense<0.000000e+00> : vector<64x128xf32>
    %10 = tpu.matmul %8, %9, %cst {dimension_numbers = #tpu.dot_dimension_numbers<[1], [0], [0], [1], [0, 0, 1, 1], [], []>} : vector<64x128xf32>, vector<128x128xf32>, vector<64x128xf32> -> vector<64x128xf32>
    %c0_4 = arith.constant 0 : index
    %c0_5 = arith.constant 0 : index
    %11 = vector.load %arg8[%c0_4, %c0_5] : memref<64x128xf32, #tpu.memory_space<vmem>>, vector<64x128xf32>
    tpu.vector_store %arg8[%c0_4, %c0_5], %10 {strides = array<i32>} : memref<64x128xf32, #tpu.memory_space<vmem>>, vector<64x128xf32>,
    %c0_6 = arith.constant 0 : index
    %c0_7 = arith.constant 0 : index
    %12 = vector.load %arg3[%c0_6, %c0_7] : memref<32x128xf32, #tpu.memory_space<vmem>>, vector<32x128xf32>
    %c0_8 = arith.constant 0 : index
    %c0_9 = arith.constant 0 : index
    %13 = vector.load %arg4[%c0_8, %c0_9] : memref<8x32xi32, #tpu.memory_space<vmem>>, vector<8x32xi32>
    %c8_i32 = arith.constant 8 : i32
    %14 = arith.muli %arg0, %c8_i32 : i32
    %c0_10 = arith.constant 0 : index
    %c0_11 = arith.constant 0 : index
    %15 = vector.load %arg9[%c0_10, %c0_11] : memref<8x32xf32, #tpu.memory_space<vmem>>, vector<8x32xf32>
    %c0_12 = arith.constant 0 : index
    %c0_13 = arith.constant 0 : index
    %16 = vector.load %arg10[%c0_12, %c0_13] : memref<8x32xf32, #tpu.memory_space<vmem>>, vector<8x32xf32>
    %c0_i32_14 = arith.constant 0 : i32
    %c8_i32_15 = arith.constant 8 : i32
    %17 = arith.muli %c0_i32_14, %c8_i32_15 : i32
    %18 = tpu.assume_multiple %17, 8 : i32
    %19 = arith.index_cast %18 : i32 to index
    %c0_16 = arith.constant 0 : index
    %20 = vector.load %arg8[%19, %c0_16] : memref<64x128xf32, #tpu.memory_space<vmem>>, vector<8x128xf32>
    %cst_17 = arith.constant dense<0.000000e+00> : vector<8x128xf32>
    %21 = tpu.matmul %15, %12, %cst_17 {dimension_numbers = #tpu.dot_dimension_numbers<[1], [0], [0], [1], [0, 0, 1, 1], [], []>} : vector<8x32xf32>, vector<32x128xf32>, vector<8x128xf32> -> vector<8x128xf32>
    %22 = arith.addf %20, %21 : vector<8x128xf32>
    %23 = arith.negf %22 : vector<8x128xf32>
    %24 = math.exp %23 : vector<8x128xf32>
    %cst_18 = arith.constant 1.000000e+00 : f32
    %25 = vector.broadcast %cst_18 : f32 to vector<8x128xf32>
    %26 = arith.addf %25, %24 : vector<8x128xf32>
    %27 = arith.divf %25, %26 : vector<8x128xf32>
    %28 = vector.extract_strided_slice %27 {offsets = [0, 0], sizes = [8, 32], strides = [1, 1]} : vector<8x128xf32> to vector<8x32xf32>
    %29 = vector.extract_strided_slice %27 {offsets = [0, 32], sizes = [8, 32], strides = [1, 1]} : vector<8x128xf32> to vector<8x32xf32>
    %30 = vector.extract_strided_slice %27 {offsets = [0, 64], sizes = [8, 32], strides = [1, 1]} : vector<8x128xf32> to vector<8x32xf32>
    %cst_19 = arith.constant 2.000000e+00 : f32
    %31 = vector.broadcast %cst_19 : f32 to vector<8x32xf32>
    %32 = arith.mulf %31, %30 : vector<8x32xf32>
    %cst_20 = arith.constant 1.000000e+00 : f32
    %33 = vector.broadcast %cst_20 : f32 to vector<8x32xf32>
    %34 = arith.subf %32, %33 : vector<8x32xf32>
    %35 = vector.extract_strided_slice %27 {offsets = [0, 96], sizes = [8, 32], strides = [1, 1]} : vector<8x128xf32> to vector<8x32xf32>
    %36 = arith.mulf %29, %16 : vector<8x32xf32>
    %37 = arith.mulf %28, %34 : vector<8x32xf32>
    %38 = arith.addf %36, %37 : vector<8x32xf32>
    %39 = math.tanh %38 : vector<8x32xf32>
    %40 = arith.mulf %35, %39 : vector<8x32xf32>
    %41 = arith.addi %14, %c0_i32_14 : i32
    %42 = vector.broadcast %41 : i32 to vector<8x32xi32>
    %43 = arith.cmpi slt, %42, %13 : vector<8x32xi32>
    %44 = arith.select %43, %38, %16 : vector<8x32xi1>, vector<8x32xf32>
    %45 = arith.select %43, %40, %15 : vector<8x32xi1>, vector<8x32xf32>
    %cst_21 = arith.constant 0.000000e+00 : f32
    %46 = vector.broadcast %cst_21 : f32 to vector<8x32xf32>
    %47 = arith.select %43, %40, %46 : vector<8x32xi1>, vector<8x32xf32>
    %48 = arith.index_cast %c0_i32_14 : i32 to index
    %c0_22 = arith.constant 0 : index
    %c0_23 = arith.constant 0 : index
    %49 = vector.load %arg5[%48, %c0_22, %c0_23] : memref<8x8x32xf32, #tpu.memory_space<vmem>>, vector<1x8x32xf32>
    %50 = vector.shape_cast %49 : vector<1x8x32xf32> to vector<8x32xf32>
    %51 = vector.shape_cast %47 : vector<8x32xf32> to vector<1x8x32xf32>
    tpu.vector_store %arg5[%48, %c0_22, %c0_23], %51 {strides = array<i32>} : memref<8x8x32xf32, #tpu.memory_space<vmem>>, vector<1x8x32xf32>,
    %c1_i32 = arith.constant 1 : i32
    %c8_i32_24 = arith.constant 8 : i32
    %52 = arith.muli %c1_i32, %c8_i32_24 : i32
    %53 = tpu.assume_multiple %52, 8 : i32
    %54 = arith.index_cast %53 : i32 to index
    %c0_25 = arith.constant 0 : index
    %55 = vector.load %arg8[%54, %c0_25] : memref<64x128xf32, #tpu.memory_space<vmem>>, vector<8x128xf32>
    %cst_26 = arith.constant dense<0.000000e+00> : vector<8x128xf32>
    %56 = tpu.matmul %45, %12, %cst_26 {dimension_numbers = #tpu.dot_dimension_numbers<[1], [0], [0], [1], [0, 0, 1, 1], [], []>} : vector<8x32xf32>, vector<32x128xf32>, vector<8x128xf32> -> vector<8x128xf32>
    %57 = arith.addf %55, %56 : vector<8x128xf32>
    %58 = arith.negf %57 : vector<8x128xf32>
    %59 = math.exp %58 : vector<8x128xf32>
    %cst_27 = arith.constant 1.000000e+00 : f32
    %60 = vector.broadcast %cst_27 : f32 to vector<8x128xf32>
    %61 = arith.addf %60, %59 : vector<8x128xf32>
    %62 = arith.divf %60, %61 : vector<8x128xf32>
    %63 = vector.extract_strided_slice %62 {offsets = [0, 0], sizes = [8, 32], strides = [1, 1]} : vector<8x128xf32> to vector<8x32xf32>
    %64 = vector.extract_strided_slice %62 {offsets = [0, 32], sizes = [8, 32], strides = [1, 1]} : vector<8x128xf32> to vector<8x32xf32>
    %65 = vector.extract_strided_slice %62 {offsets = [0, 64], sizes = [8, 32], strides = [1, 1]} : vector<8x128xf32> to vector<8x32xf32>
    %cst_28 = arith.constant 2.000000e+00 : f32
    %66 = vector.broadcast %cst_28 : f32 to vector<8x32xf32>
    %67 = arith.mulf %66, %65 : vector<8x32xf32>
    %cst_29 = arith.constant 1.000000e+00 : f32
    %68 = vector.broadcast %cst_29 : f32 to vector<8x32xf32>
    %69 = arith.subf %67, %68 : vector<8x32xf32>
    %70 = vector.extract_strided_slice %62 {offsets = [0, 96], sizes = [8, 32], strides = [1, 1]} : vector<8x128xf32> to vector<8x32xf32>
    %71 = arith.mulf %64, %44 : vector<8x32xf32>
    %72 = arith.mulf %63, %69 : vector<8x32xf32>
    %73 = arith.addf %71, %72 : vector<8x32xf32>
    %74 = math.tanh %73 : vector<8x32xf32>
    %75 = arith.mulf %70, %74 : vector<8x32xf32>
    %76 = arith.addi %14, %c1_i32 : i32
    %77 = vector.broadcast %76 : i32 to vector<8x32xi32>
    %78 = arith.cmpi slt, %77, %13 : vector<8x32xi32>
    %79 = arith.select %78, %73, %44 : vector<8x32xi1>, vector<8x32xf32>
    %80 = arith.select %78, %75, %45 : vector<8x32xi1>, vector<8x32xf32>
    %cst_30 = arith.constant 0.000000e+00 : f32
    %81 = vector.broadcast %cst_30 : f32 to vector<8x32xf32>
    %82 = arith.select %78, %75, %81 : vector<8x32xi1>, vector<8x32xf32>
    %83 = arith.index_cast %c1_i32 : i32 to index
    %c0_31 = arith.constant 0 : index
    %c0_32 = arith.constant 0 : index
    %84 = vector.load %arg5[%83, %c0_31, %c0_32] : memref<8x8x32xf32, #tpu.memory_space<vmem>>, vector<1x8x32xf32>
    %85 = vector.shape_cast %84 : vector<1x8x32xf32> to vector<8x32xf32>
    %86 = vector.shape_cast %82 : vector<8x32xf32> to vector<1x8x32xf32>
    tpu.vector_store %arg5[%83, %c0_31, %c0_32], %86 {strides = array<i32>} : memref<8x8x32xf32, #tpu.memory_space<vmem>>, vector<1x8x32xf32>,
    %c2_i32 = arith.constant 2 : i32
    %c8_i32_33 = arith.constant 8 : i32
    %87 = arith.muli %c2_i32, %c8_i32_33 : i32
    %88 = tpu.assume_multiple %87, 8 : i32
    %89 = arith.index_cast %88 : i32 to index
    %c0_34 = arith.constant 0 : index
    %90 = vector.load %arg8[%89, %c0_34] : memref<64x128xf32, #tpu.memory_space<vmem>>, vector<8x128xf32>
    %cst_35 = arith.constant dense<0.000000e+00> : vector<8x128xf32>
    %91 = tpu.matmul %80, %12, %cst_35 {dimension_numbers = #tpu.dot_dimension_numbers<[1], [0], [0], [1], [0, 0, 1, 1], [], []>} : vector<8x32xf32>, vector<32x128xf32>, vector<8x128xf32> -> vector<8x128xf32>
    %92 = arith.addf %90, %91 : vector<8x128xf32>
    %93 = arith.negf %92 : vector<8x128xf32>
    %94 = math.exp %93 : vector<8x128xf32>
    %cst_36 = arith.constant 1.000000e+00 : f32
    %95 = vector.broadcast %cst_36 : f32 to vector<8x128xf32>
    %96 = arith.addf %95, %94 : vector<8x128xf32>
    %97 = arith.divf %95, %96 : vector<8x128xf32>
    %98 = vector.extract_strided_slice %97 {offsets = [0, 0], sizes = [8, 32], strides = [1, 1]} : vector<8x128xf32> to vector<8x32xf32>
    %99 = vector.extract_strided_slice %97 {offsets = [0, 32], sizes = [8, 32], strides = [1, 1]} : vector<8x128xf32> to vector<8x32xf32>
    %100 = vector.extract_strided_slice %97 {offsets = [0, 64], sizes = [8, 32], strides = [1, 1]} : vector<8x128xf32> to vector<8x32xf32>
    %cst_37 = arith.constant 2.000000e+00 : f32
    %101 = vector.broadcast %cst_37 : f32 to vector<8x32xf32>
    %102 = arith.mulf %101, %100 : vector<8x32xf32>
    %cst_38 = arith.constant 1.000000e+00 : f32
    %103 = vector.broadcast %cst_38 : f32 to vector<8x32xf32>
    %104 = arith.subf %102, %103 : vector<8x32xf32>
    %105 = vector.extract_strided_slice %97 {offsets = [0, 96], sizes = [8, 32], strides = [1, 1]} : vector<8x128xf32> to vector<8x32xf32>
    %106 = arith.mulf %99, %79 : vector<8x32xf32>
    %107 = arith.mulf %98, %104 : vector<8x32xf32>
    %108 = arith.addf %106, %107 : vector<8x32xf32>
    %109 = math.tanh %108 : vector<8x32xf32>
    %110 = arith.mulf %105, %109 : vector<8x32xf32>
    %111 = arith.addi %14, %c2_i32 : i32
    %112 = vector.broadcast %111 : i32 to vector<8x32xi32>
    %113 = arith.cmpi slt, %112, %13 : vector<8x32xi32>
    %114 = arith.select %113, %108, %79 : vector<8x32xi1>, vector<8x32xf32>
    %115 = arith.select %113, %110, %80 : vector<8x32xi1>, vector<8x32xf32>
    %cst_39 = arith.constant 0.000000e+00 : f32
    %116 = vector.broadcast %cst_39 : f32 to vector<8x32xf32>
    %117 = arith.select %113, %110, %116 : vector<8x32xi1>, vector<8x32xf32>
    %118 = arith.index_cast %c2_i32 : i32 to index
    %c0_40 = arith.constant 0 : index
    %c0_41 = arith.constant 0 : index
    %119 = vector.load %arg5[%118, %c0_40, %c0_41] : memref<8x8x32xf32, #tpu.memory_space<vmem>>, vector<1x8x32xf32>
    %120 = vector.shape_cast %119 : vector<1x8x32xf32> to vector<8x32xf32>
    %121 = vector.shape_cast %117 : vector<8x32xf32> to vector<1x8x32xf32>
    tpu.vector_store %arg5[%118, %c0_40, %c0_41], %121 {strides = array<i32>} : memref<8x8x32xf32, #tpu.memory_space<vmem>>, vector<1x8x32xf32>,
    %c3_i32 = arith.constant 3 : i32
    %c8_i32_42 = arith.constant 8 : i32
    %122 = arith.muli %c3_i32, %c8_i32_42 : i32
    %123 = tpu.assume_multiple %122, 8 : i32
    %124 = arith.index_cast %123 : i32 to index
    %c0_43 = arith.constant 0 : index
    %125 = vector.load %arg8[%124, %c0_43] : memref<64x128xf32, #tpu.memory_space<vmem>>, vector<8x128xf32>
    %cst_44 = arith.constant dense<0.000000e+00> : vector<8x128xf32>
    %126 = tpu.matmul %115, %12, %cst_44 {dimension_numbers = #tpu.dot_dimension_numbers<[1], [0], [0], [1], [0, 0, 1, 1], [], []>} : vector<8x32xf32>, vector<32x128xf32>, vector<8x128xf32> -> vector<8x128xf32>
    %127 = arith.addf %125, %126 : vector<8x128xf32>
    %128 = arith.negf %127 : vector<8x128xf32>
    %129 = math.exp %128 : vector<8x128xf32>
    %cst_45 = arith.constant 1.000000e+00 : f32
    %130 = vector.broadcast %cst_45 : f32 to vector<8x128xf32>
    %131 = arith.addf %130, %129 : vector<8x128xf32>
    %132 = arith.divf %130, %131 : vector<8x128xf32>
    %133 = vector.extract_strided_slice %132 {offsets = [0, 0], sizes = [8, 32], strides = [1, 1]} : vector<8x128xf32> to vector<8x32xf32>
    %134 = vector.extract_strided_slice %132 {offsets = [0, 32], sizes = [8, 32], strides = [1, 1]} : vector<8x128xf32> to vector<8x32xf32>
    %135 = vector.extract_strided_slice %132 {offsets = [0, 64], sizes = [8, 32], strides = [1, 1]} : vector<8x128xf32> to vector<8x32xf32>
    %cst_46 = arith.constant 2.000000e+00 : f32
    %136 = vector.broadcast %cst_46 : f32 to vector<8x32xf32>
    %137 = arith.mulf %136, %135 : vector<8x32xf32>
    %cst_47 = arith.constant 1.000000e+00 : f32
    %138 = vector.broadcast %cst_47 : f32 to vector<8x32xf32>
    %139 = arith.subf %137, %138 : vector<8x32xf32>
    %140 = vector.extract_strided_slice %132 {offsets = [0, 96], sizes = [8, 32], strides = [1, 1]} : vector<8x128xf32> to vector<8x32xf32>
    %141 = arith.mulf %134, %114 : vector<8x32xf32>
    %142 = arith.mulf %133, %139 : vector<8x32xf32>
    %143 = arith.addf %141, %142 : vector<8x32xf32>
    %144 = math.tanh %143 : vector<8x32xf32>
    %145 = arith.mulf %140, %144 : vector<8x32xf32>
    %146 = arith.addi %14, %c3_i32 : i32
    %147 = vector.broadcast %146 : i32 to vector<8x32xi32>
    %148 = arith.cmpi slt, %147, %13 : vector<8x32xi32>
    %149 = arith.select %148, %143, %114 : vector<8x32xi1>, vector<8x32xf32>
    %150 = arith.select %148, %145, %115 : vector<8x32xi1>, vector<8x32xf32>
    %cst_48 = arith.constant 0.000000e+00 : f32
    %151 = vector.broadcast %cst_48 : f32 to vector<8x32xf32>
    %152 = arith.select %148, %145, %151 : vector<8x32xi1>, vector<8x32xf32>
    %153 = arith.index_cast %c3_i32 : i32 to index
    %c0_49 = arith.constant 0 : index
    %c0_50 = arith.constant 0 : index
    %154 = vector.load %arg5[%153, %c0_49, %c0_50] : memref<8x8x32xf32, #tpu.memory_space<vmem>>, vector<1x8x32xf32>
    %155 = vector.shape_cast %154 : vector<1x8x32xf32> to vector<8x32xf32>
    %156 = vector.shape_cast %152 : vector<8x32xf32> to vector<1x8x32xf32>
    tpu.vector_store %arg5[%153, %c0_49, %c0_50], %156 {strides = array<i32>} : memref<8x8x32xf32, #tpu.memory_space<vmem>>, vector<1x8x32xf32>,
    %c4_i32 = arith.constant 4 : i32
    %c8_i32_51 = arith.constant 8 : i32
    %157 = arith.muli %c4_i32, %c8_i32_51 : i32
    %158 = tpu.assume_multiple %157, 8 : i32
    %159 = arith.index_cast %158 : i32 to index
    %c0_52 = arith.constant 0 : index
    %160 = vector.load %arg8[%159, %c0_52] : memref<64x128xf32, #tpu.memory_space<vmem>>, vector<8x128xf32>
    %cst_53 = arith.constant dense<0.000000e+00> : vector<8x128xf32>
    %161 = tpu.matmul %150, %12, %cst_53 {dimension_numbers = #tpu.dot_dimension_numbers<[1], [0], [0], [1], [0, 0, 1, 1], [], []>} : vector<8x32xf32>, vector<32x128xf32>, vector<8x128xf32> -> vector<8x128xf32>
    %162 = arith.addf %160, %161 : vector<8x128xf32>
    %163 = arith.negf %162 : vector<8x128xf32>
    %164 = math.exp %163 : vector<8x128xf32>
    %cst_54 = arith.constant 1.000000e+00 : f32
    %165 = vector.broadcast %cst_54 : f32 to vector<8x128xf32>
    %166 = arith.addf %165, %164 : vector<8x128xf32>
    %167 = arith.divf %165, %166 : vector<8x128xf32>
    %168 = vector.extract_strided_slice %167 {offsets = [0, 0], sizes = [8, 32], strides = [1, 1]} : vector<8x128xf32> to vector<8x32xf32>
    %169 = vector.extract_strided_slice %167 {offsets = [0, 32], sizes = [8, 32], strides = [1, 1]} : vector<8x128xf32> to vector<8x32xf32>
    %170 = vector.extract_strided_slice %167 {offsets = [0, 64], sizes = [8, 32], strides = [1, 1]} : vector<8x128xf32> to vector<8x32xf32>
    %cst_55 = arith.constant 2.000000e+00 : f32
    %171 = vector.broadcast %cst_55 : f32 to vector<8x32xf32>
    %172 = arith.mulf %171, %170 : vector<8x32xf32>
    %cst_56 = arith.constant 1.000000e+00 : f32
    %173 = vector.broadcast %cst_56 : f32 to vector<8x32xf32>
    %174 = arith.subf %172, %173 : vector<8x32xf32>
    %175 = vector.extract_strided_slice %167 {offsets = [0, 96], sizes = [8, 32], strides = [1, 1]} : vector<8x128xf32> to vector<8x32xf32>
    %176 = arith.mulf %169, %149 : vector<8x32xf32>
    %177 = arith.mulf %168, %174 : vector<8x32xf32>
    %178 = arith.addf %176, %177 : vector<8x32xf32>
    %179 = math.tanh %178 : vector<8x32xf32>
    %180 = arith.mulf %175, %179 : vector<8x32xf32>
    %181 = arith.addi %14, %c4_i32 : i32
    %182 = vector.broadcast %181 : i32 to vector<8x32xi32>
    %183 = arith.cmpi slt, %182, %13 : vector<8x32xi32>
    %184 = arith.select %183, %178, %149 : vector<8x32xi1>, vector<8x32xf32>
    %185 = arith.select %183, %180, %150 : vector<8x32xi1>, vector<8x32xf32>
    %cst_57 = arith.constant 0.000000e+00 : f32
    %186 = vector.broadcast %cst_57 : f32 to vector<8x32xf32>
    %187 = arith.select %183, %180, %186 : vector<8x32xi1>, vector<8x32xf32>
    %188 = arith.index_cast %c4_i32 : i32 to index
    %c0_58 = arith.constant 0 : index
    %c0_59 = arith.constant 0 : index
    %189 = vector.load %arg5[%188, %c0_58, %c0_59] : memref<8x8x32xf32, #tpu.memory_space<vmem>>, vector<1x8x32xf32>
    %190 = vector.shape_cast %189 : vector<1x8x32xf32> to vector<8x32xf32>
    %191 = vector.shape_cast %187 : vector<8x32xf32> to vector<1x8x32xf32>
    tpu.vector_store %arg5[%188, %c0_58, %c0_59], %191 {strides = array<i32>} : memref<8x8x32xf32, #tpu.memory_space<vmem>>, vector<1x8x32xf32>,
    %c5_i32 = arith.constant 5 : i32
    %c8_i32_60 = arith.constant 8 : i32
    %192 = arith.muli %c5_i32, %c8_i32_60 : i32
    %193 = tpu.assume_multiple %192, 8 : i32
    %194 = arith.index_cast %193 : i32 to index
    %c0_61 = arith.constant 0 : index
    %195 = vector.load %arg8[%194, %c0_61] : memref<64x128xf32, #tpu.memory_space<vmem>>, vector<8x128xf32>
    %cst_62 = arith.constant dense<0.000000e+00> : vector<8x128xf32>
    %196 = tpu.matmul %185, %12, %cst_62 {dimension_numbers = #tpu.dot_dimension_numbers<[1], [0], [0], [1], [0, 0, 1, 1], [], []>} : vector<8x32xf32>, vector<32x128xf32>, vector<8x128xf32> -> vector<8x128xf32>
    %197 = arith.addf %195, %196 : vector<8x128xf32>
    %198 = arith.negf %197 : vector<8x128xf32>
    %199 = math.exp %198 : vector<8x128xf32>
    %cst_63 = arith.constant 1.000000e+00 : f32
    %200 = vector.broadcast %cst_63 : f32 to vector<8x128xf32>
    %201 = arith.addf %200, %199 : vector<8x128xf32>
    %202 = arith.divf %200, %201 : vector<8x128xf32>
    %203 = vector.extract_strided_slice %202 {offsets = [0, 0], sizes = [8, 32], strides = [1, 1]} : vector<8x128xf32> to vector<8x32xf32>
    %204 = vector.extract_strided_slice %202 {offsets = [0, 32], sizes = [8, 32], strides = [1, 1]} : vector<8x128xf32> to vector<8x32xf32>
    %205 = vector.extract_strided_slice %202 {offsets = [0, 64], sizes = [8, 32], strides = [1, 1]} : vector<8x128xf32> to vector<8x32xf32>
    %cst_64 = arith.constant 2.000000e+00 : f32
    %206 = vector.broadcast %cst_64 : f32 to vector<8x32xf32>
    %207 = arith.mulf %206, %205 : vector<8x32xf32>
    %cst_65 = arith.constant 1.000000e+00 : f32
    %208 = vector.broadcast %cst_65 : f32 to vector<8x32xf32>
    %209 = arith.subf %207, %208 : vector<8x32xf32>
    %210 = vector.extract_strided_slice %202 {offsets = [0, 96], sizes = [8, 32], strides = [1, 1]} : vector<8x128xf32> to vector<8x32xf32>
    %211 = arith.mulf %204, %184 : vector<8x32xf32>
    %212 = arith.mulf %203, %209 : vector<8x32xf32>
    %213 = arith.addf %211, %212 : vector<8x32xf32>
    %214 = math.tanh %213 : vector<8x32xf32>
    %215 = arith.mulf %210, %214 : vector<8x32xf32>
    %216 = arith.addi %14, %c5_i32 : i32
    %217 = vector.broadcast %216 : i32 to vector<8x32xi32>
    %218 = arith.cmpi slt, %217, %13 : vector<8x32xi32>
    %219 = arith.select %218, %213, %184 : vector<8x32xi1>, vector<8x32xf32>
    %220 = arith.select %218, %215, %185 : vector<8x32xi1>, vector<8x32xf32>
    %cst_66 = arith.constant 0.000000e+00 : f32
    %221 = vector.broadcast %cst_66 : f32 to vector<8x32xf32>
    %222 = arith.select %218, %215, %221 : vector<8x32xi1>, vector<8x32xf32>
    %223 = arith.index_cast %c5_i32 : i32 to index
    %c0_67 = arith.constant 0 : index
    %c0_68 = arith.constant 0 : index
    %224 = vector.load %arg5[%223, %c0_67, %c0_68] : memref<8x8x32xf32, #tpu.memory_space<vmem>>, vector<1x8x32xf32>
    %225 = vector.shape_cast %224 : vector<1x8x32xf32> to vector<8x32xf32>
    %226 = vector.shape_cast %222 : vector<8x32xf32> to vector<1x8x32xf32>
    tpu.vector_store %arg5[%223, %c0_67, %c0_68], %226 {strides = array<i32>} : memref<8x8x32xf32, #tpu.memory_space<vmem>>, vector<1x8x32xf32>,
    %c6_i32 = arith.constant 6 : i32
    %c8_i32_69 = arith.constant 8 : i32
    %227 = arith.muli %c6_i32, %c8_i32_69 : i32
    %228 = tpu.assume_multiple %227, 8 : i32
    %229 = arith.index_cast %228 : i32 to index
    %c0_70 = arith.constant 0 : index
    %230 = vector.load %arg8[%229, %c0_70] : memref<64x128xf32, #tpu.memory_space<vmem>>, vector<8x128xf32>
    %cst_71 = arith.constant dense<0.000000e+00> : vector<8x128xf32>
    %231 = tpu.matmul %220, %12, %cst_71 {dimension_numbers = #tpu.dot_dimension_numbers<[1], [0], [0], [1], [0, 0, 1, 1], [], []>} : vector<8x32xf32>, vector<32x128xf32>, vector<8x128xf32> -> vector<8x128xf32>
    %232 = arith.addf %230, %231 : vector<8x128xf32>
    %233 = arith.negf %232 : vector<8x128xf32>
    %234 = math.exp %233 : vector<8x128xf32>
    %cst_72 = arith.constant 1.000000e+00 : f32
    %235 = vector.broadcast %cst_72 : f32 to vector<8x128xf32>
    %236 = arith.addf %235, %234 : vector<8x128xf32>
    %237 = arith.divf %235, %236 : vector<8x128xf32>
    %238 = vector.extract_strided_slice %237 {offsets = [0, 0], sizes = [8, 32], strides = [1, 1]} : vector<8x128xf32> to vector<8x32xf32>
    %239 = vector.extract_strided_slice %237 {offsets = [0, 32], sizes = [8, 32], strides = [1, 1]} : vector<8x128xf32> to vector<8x32xf32>
    %240 = vector.extract_strided_slice %237 {offsets = [0, 64], sizes = [8, 32], strides = [1, 1]} : vector<8x128xf32> to vector<8x32xf32>
    %cst_73 = arith.constant 2.000000e+00 : f32
    %241 = vector.broadcast %cst_73 : f32 to vector<8x32xf32>
    %242 = arith.mulf %241, %240 : vector<8x32xf32>
    %cst_74 = arith.constant 1.000000e+00 : f32
    %243 = vector.broadcast %cst_74 : f32 to vector<8x32xf32>
    %244 = arith.subf %242, %243 : vector<8x32xf32>
    %245 = vector.extract_strided_slice %237 {offsets = [0, 96], sizes = [8, 32], strides = [1, 1]} : vector<8x128xf32> to vector<8x32xf32>
    %246 = arith.mulf %239, %219 : vector<8x32xf32>
    %247 = arith.mulf %238, %244 : vector<8x32xf32>
    %248 = arith.addf %246, %247 : vector<8x32xf32>
    %249 = math.tanh %248 : vector<8x32xf32>
    %250 = arith.mulf %245, %249 : vector<8x32xf32>
    %251 = arith.addi %14, %c6_i32 : i32
    %252 = vector.broadcast %251 : i32 to vector<8x32xi32>
    %253 = arith.cmpi slt, %252, %13 : vector<8x32xi32>
    %254 = arith.select %253, %248, %219 : vector<8x32xi1>, vector<8x32xf32>
    %255 = arith.select %253, %250, %220 : vector<8x32xi1>, vector<8x32xf32>
    %cst_75 = arith.constant 0.000000e+00 : f32
    %256 = vector.broadcast %cst_75 : f32 to vector<8x32xf32>
    %257 = arith.select %253, %250, %256 : vector<8x32xi1>, vector<8x32xf32>
    %258 = arith.index_cast %c6_i32 : i32 to index
    %c0_76 = arith.constant 0 : index
    %c0_77 = arith.constant 0 : index
    %259 = vector.load %arg5[%258, %c0_76, %c0_77] : memref<8x8x32xf32, #tpu.memory_space<vmem>>, vector<1x8x32xf32>
    %260 = vector.shape_cast %259 : vector<1x8x32xf32> to vector<8x32xf32>
    %261 = vector.shape_cast %257 : vector<8x32xf32> to vector<1x8x32xf32>
    tpu.vector_store %arg5[%258, %c0_76, %c0_77], %261 {strides = array<i32>} : memref<8x8x32xf32, #tpu.memory_space<vmem>>, vector<1x8x32xf32>,
    %c7_i32 = arith.constant 7 : i32
    %c8_i32_78 = arith.constant 8 : i32
    %262 = arith.muli %c7_i32, %c8_i32_78 : i32
    %263 = tpu.assume_multiple %262, 8 : i32
    %264 = arith.index_cast %263 : i32 to index
    %c0_79 = arith.constant 0 : index
    %265 = vector.load %arg8[%264, %c0_79] : memref<64x128xf32, #tpu.memory_space<vmem>>, vector<8x128xf32>
    %cst_80 = arith.constant dense<0.000000e+00> : vector<8x128xf32>
    %266 = tpu.matmul %255, %12, %cst_80 {dimension_numbers = #tpu.dot_dimension_numbers<[1], [0], [0], [1], [0, 0, 1, 1], [], []>} : vector<8x32xf32>, vector<32x128xf32>, vector<8x128xf32> -> vector<8x128xf32>
    %267 = arith.addf %265, %266 : vector<8x128xf32>
    %268 = arith.negf %267 : vector<8x128xf32>
    %269 = math.exp %268 : vector<8x128xf32>
    %cst_81 = arith.constant 1.000000e+00 : f32
    %270 = vector.broadcast %cst_81 : f32 to vector<8x128xf32>
    %271 = arith.addf %270, %269 : vector<8x128xf32>
    %272 = arith.divf %270, %271 : vector<8x128xf32>
    %273 = vector.extract_strided_slice %272 {offsets = [0, 0], sizes = [8, 32], strides = [1, 1]} : vector<8x128xf32> to vector<8x32xf32>
    %274 = vector.extract_strided_slice %272 {offsets = [0, 32], sizes = [8, 32], strides = [1, 1]} : vector<8x128xf32> to vector<8x32xf32>
    %275 = vector.extract_strided_slice %272 {offsets = [0, 64], sizes = [8, 32], strides = [1, 1]} : vector<8x128xf32> to vector<8x32xf32>
    %cst_82 = arith.constant 2.000000e+00 : f32
    %276 = vector.broadcast %cst_82 : f32 to vector<8x32xf32>
    %277 = arith.mulf %276, %275 : vector<8x32xf32>
    %cst_83 = arith.constant 1.000000e+00 : f32
    %278 = vector.broadcast %cst_83 : f32 to vector<8x32xf32>
    %279 = arith.subf %277, %278 : vector<8x32xf32>
    %280 = vector.extract_strided_slice %272 {offsets = [0, 96], sizes = [8, 32], strides = [1, 1]} : vector<8x128xf32> to vector<8x32xf32>
    %281 = arith.mulf %274, %254 : vector<8x32xf32>
    %282 = arith.mulf %273, %279 : vector<8x32xf32>
    %283 = arith.addf %281, %282 : vector<8x32xf32>
    %284 = math.tanh %283 : vector<8x32xf32>
    %285 = arith.mulf %280, %284 : vector<8x32xf32>
    %286 = arith.addi %14, %c7_i32 : i32
    %287 = vector.broadcast %286 : i32 to vector<8x32xi32>
    %288 = arith.cmpi slt, %287, %13 : vector<8x32xi32>
    %289 = arith.select %288, %283, %254 : vector<8x32xi1>, vector<8x32xf32>
    %290 = arith.select %288, %285, %255 : vector<8x32xi1>, vector<8x32xf32>
    %cst_84 = arith.constant 0.000000e+00 : f32
    %291 = vector.broadcast %cst_84 : f32 to vector<8x32xf32>
    %292 = arith.select %288, %285, %291 : vector<8x32xi1>, vector<8x32xf32>
    %293 = arith.index_cast %c7_i32 : i32 to index
    %c0_85 = arith.constant 0 : index
    %c0_86 = arith.constant 0 : index
    %294 = vector.load %arg5[%293, %c0_85, %c0_86] : memref<8x8x32xf32, #tpu.memory_space<vmem>>, vector<1x8x32xf32>
    %295 = vector.shape_cast %294 : vector<1x8x32xf32> to vector<8x32xf32>
    %296 = vector.shape_cast %292 : vector<8x32xf32> to vector<1x8x32xf32>
    tpu.vector_store %arg5[%293, %c0_85, %c0_86], %296 {strides = array<i32>} : memref<8x8x32xf32, #tpu.memory_space<vmem>>, vector<1x8x32xf32>,
    %c8_i32_87 = arith.constant 8 : i32
    %c0_88 = arith.constant 0 : index
    %c0_89 = arith.constant 0 : index
    %297 = vector.load %arg9[%c0_88, %c0_89] : memref<8x32xf32, #tpu.memory_space<vmem>>, vector<8x32xf32>
    tpu.vector_store %arg9[%c0_88, %c0_89], %290 {strides = array<i32>} : memref<8x32xf32, #tpu.memory_space<vmem>>, vector<8x32xf32>,
    %c0_90 = arith.constant 0 : index
    %c0_91 = arith.constant 0 : index
    %298 = vector.load %arg10[%c0_90, %c0_91] : memref<8x32xf32, #tpu.memory_space<vmem>>, vector<8x32xf32>
    tpu.vector_store %arg10[%c0_90, %c0_91], %289 {strides = array<i32>} : memref<8x32xf32, #tpu.memory_space<vmem>>, vector<8x32xf32>,
    %c0_92 = arith.constant 0 : index
    %c0_93 = arith.constant 0 : index
    %c0_94 = arith.constant 0 : index
    %299 = vector.load %arg6[%c0_92, %c0_93, %c0_94] : memref<1x8x32xf32, #tpu.memory_space<vmem>>, vector<1x8x32xf32>
    %300 = vector.shape_cast %299 : vector<1x8x32xf32> to vector<8x32xf32>
    %301 = vector.shape_cast %290 : vector<8x32xf32> to vector<1x8x32xf32>
    tpu.vector_store %arg6[%c0_92, %c0_93, %c0_94], %301 {strides = array<i32>} : memref<1x8x32xf32, #tpu.memory_space<vmem>>, vector<1x8x32xf32>,
    %c0_95 = arith.constant 0 : index
    %c0_96 = arith.constant 0 : index
    %c0_97 = arith.constant 0 : index
    %302 = vector.load %arg7[%c0_95, %c0_96, %c0_97] : memref<1x8x32xf32, #tpu.memory_space<vmem>>, vector<1x8x32xf32>
    %303 = vector.shape_cast %302 : vector<1x8x32xf32> to vector<8x32xf32>
    %304 = vector.shape_cast %289 : vector<8x32xf32> to vector<1x8x32xf32>
    tpu.vector_store %arg7[%c0_95, %c0_96, %c0_97], %304 {strides = array<i32>} : memref<1x8x32xf32, #tpu.memory_space<vmem>>, vector<1x8x32xf32>,
    return
  }
  func.func @transform_0(%arg0: i32) -> (i32, i32) {
    %c0_i32 = arith.constant 0 : i32
    %c0_i32_0 = arith.constant 0 : i32
    return %arg0, %c0_i32 : i32, i32
  }
  func.func @transform_1(%arg0: i32) -> (i32, i32) {
    %c0_i32 = arith.constant 0 : i32
    %c0_i32_0 = arith.constant 0 : i32
    %c0_i32_1 = arith.constant 0 : i32
    return %c0_i32, %c0_i32_0 : i32, i32
  }
  func.func @transform_2(%arg0: i32) -> (i32, i32) {
    %c0_i32 = arith.constant 0 : i32
    %c0_i32_0 = arith.constant 0 : i32
    %c0_i32_1 = arith.constant 0 : i32
    return %c0_i32, %c0_i32_0 : i32, i32
  }
  func.func @transform_3(%arg0: i32) -> (i32, i32) {
    %c0_i32 = arith.constant 0 : i32
    %c0_i32_0 = arith.constant 0 : i32
    %c0_i32_1 = arith.constant 0 : i32
    return %c0_i32, %c0_i32_0 : i32, i32
  }
  func.func @transform_4(%arg0: i32) -> (i32, i32, i32) {
    %c0_i32 = arith.constant 0 : i32
    %c0_i32_0 = arith.constant 0 : i32
    %c0_i32_1 = arith.constant 0 : i32
    return %arg0, %c0_i32, %c0_i32_0 : i32, i32, i32
  }
  func.func @transform_5(%arg0: i32) -> (i32, i32, i32) {
    %c0_i32 = arith.constant 0 : i32
    %c0_i32_0 = arith.constant 0 : i32
    %c0_i32_1 = arith.constant 0 : i32
    %c0_i32_2 = arith.constant 0 : i32
    return %c0_i32, %c0_i32_0, %c0_i32_1 : i32, i32, i32
  }
  func.func @transform_6(%arg0: i32) -> (i32, i32, i32) {
    %c0_i32 = arith.constant 0 : i32
    %c0_i32_0 = arith.constant 0 : i32
    %c0_i32_1 = arith.constant 0 : i32
    %c0_i32_2 = arith.constant 0 : i32
    return %c0_i32, %c0_i32_0, %c0_i32_1 : i32, i32, i32
  }
}

</mosaic_0001>

<bundles_post_ra>
// kernel: tpu_custom_call.1
= control target key start
LH: loop header
LB: loop body
LE: loop exit
PB: predicated region body
PF: predicated region fallthrough
CT: control target
= control target key end

     0   :  { %12 = vsyncpa [#allocation6], 0  ;;  %s2687_s0 = inlined_call_operand.vmem [shape: s32[128,1], index: 0, kind: input, shape index: {}]   ;;  %s2688_s1 = inlined_call_operand.vmem [shape: f32[128,128], index: 1, kind: input, shape index: {}]   ;;  %s2689_s2 = inlined_call_operand.hbm [shape: f32[32,128], index: 2, kind: input, shape index: {}]   ;;  %s2690_s3 = inlined_call_operand.vmem [shape: s32[8,32], index: 3, kind: input, shape index: {}]   ;;  %s2691_s4 = inlined_call_operand.hbm [shape: f32[16,8,32], index: 4, kind: output, shape index: {0}]   ;;  %s2692_s5 = inlined_call_operand.hbm [shape: f32[1,8,32], index: 5, kind: output, shape index: {1}]   ;;  %s2693_s6 = inlined_call_operand.hbm [shape: f32[1,8,32], index: 6, kind: output, shape index: {2}]  }
   0x1   :  { %13 = vsyncpa [#allocation7], 0 }
   0x2   :  { %15 = vsyncpa [#allocation7 + $0x1], 0 }
   0x3   :  { %16 = vsyncpa [#allocation10], 0  ;;  %s2242_s21 = smov 0   ;;  %s2244_s22 = smov 0  }
   0x4   :  { %s2246_s23 = smov 0   ;;  %s2248_s24 = smov 0  }
   0x5 LB: > { %s2263_s25 = sadd.s32 4294967295, %s2188_s24   ;;  %s1567_s26 = sadd.s32 4294967294, %s2188_s24   ;;  %s2188_s24 = sphi %s2248_s24, %s2719_s24   ;;  %s2184_s23 = sphi %s2246_s23, %s2718_s23   ;;  %s2180_s22 = sphi %s2244_s22, %s2717_s22   ;;  %s2176_s21 = sphi %s2242_s21, %s2716_s21  }
   0x6   : > { %s2267_s27 = sadd.s32 1, %s2188_s24   ;;  %s118_s28 = sadd.s32 1, %s2184_s23 }
   0x7   : > { %s115_s29 = ssub.s32 %s2188_s24, %s2267_s27  ;;  %p128_p0 = scmp.ne.s32.totalorder %s2184_s23, %s2180_s22 }
   0x8   : > { %p116_p1 = scmp.eq.s32.totalorder %s115_s29, 0  ;;  %p2694_p2 = scmp.eq.s32.totalorder %s2263_s25, 1 }
   0x9   : > { %p134_p3 = scmp.ne.s32.totalorder %s2180_s22, %s2176_s21  ;;  %p135_p4 = scmp.eq.s32.totalorder %s1567_s26, 1 }
   0xa   : > { %s2278_s30 = scalar_select %p116_p1, %s2184_s23, %s118_s28  }
   0xb   : > { %p2282_p5 = por %p2694_p2, %p128_p0  ;;  %p2286_p6 = por %p135_p4, %p134_p3 }
   0xc   : > { %p1568_p7 = scmp.ge.s32.totalorder %s2188_s24, 1  ;;  %p184_p8 = scmp.lt.s32.totalorder %s2188_s24, 3 }
   0xd   : > { %s2698_s7 = scalar_select %p2282_p5, 1, 0 }
   0xe   : > { %s2699_s8 = scalar_select %p2286_p6, 1, 0 }
   0xf   : > { %p2695_p10 = scmp.eq.s32.totalorder %s2263_s25, 0  ;;  %p2294_p11 = pnand %p1568_p7, %p184_p8 }
  0x10   : > { %s2190_s10 = smov [#allocation5]   ;;  %s2038_s15 = scalar_lea.hbm %s2689_s2, 512 }
  0x11   : > { %s2700_s9 = scalar_select %p2294_p11, 1, 0 }
  0x12   : > { %s199_s11 = sshll.u32 %s2190_s10, 4  ;;  %p1925_p12 = pneg %p2294_p11  ;;  %s200_s11 = int_to_ptr.vmem [resolvable:$true] %s199_s11 }
  0x13   : > { %p2039_p0 = scmp.ne.s32.totalorder %s2689_s2, %s2038_s15  ;;  %p2045_p7 = scmp.lt.u32.totalorder %s2038_s15, %s2689_s2 }
  0x14   : > { %p2302_p13 = pnand %p2695_p10, %p1925_p12 }
  0x16   : > { %p2040_p1 = pneg %p2302_p13 }
  0x18   : > { %p2041_p3 = pnand %p2040_p1, %p2039_p0 }
  0x1a   : > { %p2042_p4 = pneg %p2041_p3 }
  0x1c   : > { %p2047_p8 = pnand %p2045_p7, %p2042_p4 }
  0x1e   : > { %2050 = shalt.err (!%p2047_p8)
}
  0x1f   : > { %s2051_s20 = scalar_lea.vmem %s200_s11, 512  ;;  %p2059_p10 = scmp.lt.s32.totalorder %s200_s11, %s200_s11 }
  0x20   : > { %p2052_p12 = scmp.ne.s32.totalorder %s200_s11, %s2051_s20  ;;  %p2060_p6 = scmp.lt.s32.totalorder %s2051_s20, %s2051_s20 }
  0x22   : > { %p2054_p2 = pnand %p2052_p12, %p2040_p1  ;;  %p2061_p5 = por %p2060_p6, %p2059_p10 }
  0x24   : > { %p2055_p9 = pneg %p2054_p2 }
  0x26   : > { %p2062_p11 = pnand %p2061_p5, %p2055_p9 }
  0x28   : > { %2065 = shalt.err (!%p2062_p11)
}
  0x29   : > { %s2191_s26 = smov 128   ;;  %s2192_s28 = smov 8  }
  0x2a   : > { %1928 = dma.hbm_to_vmem [thread:$0]  (!%p2302_p13), %s2689_s2, 512, %s200_s11, [#allocation6], %s2191_s26, %s2191_s26, %s2192_s28  }
  0x2b   : > { %p2702_p0 = scmp.ne.s32.totalorder %s2700_s9, 0 }
  0x2c   : > { %p2703_p3 = scmp.eq.s32.totalorder (!%p2702_p0), %s2263_s25, 0 }
  0x2d   : > { %227 = sbr.rel (%p2702_p0) target bundleno = 6042 (0x179a), region = 36 }
  0x34   : > { %2163 = dma.done.wait (%p2703_p3), [#allocation6], 512   ;;  %p2704_p2 = pmov %p2703_p3 }
  0x35   : > { %s250_s13 = sand.u32 1, %s2180_s22   ;;  %s2330_s14 = sshll.u32 %s2263_s25, 3 }
  0x36   : > { %2165 = vsyncadd (%p2704_p2), [#allocation6], 4294966784  ;;  %s1573_s12 = sshll.u32 %s250_s13, 6  ;;  %p258_p5 = scmp.lt.s32.totalorder %s2330_s14, 15 }
  0x37   : > { %s2341_s18 = scalar_lea.vmem [#allocation8], %s1573_s12  ;;  %p2705_p6 = scmp.ne.s32.totalorder %s2263_s25, 0 }
  0x38   : > { %s259_s11 = scalar_select %p258_p5, %s2330_s14, 15 }
  0x39   : > { %267 = sbr.rel (%p2705_p6) target bundleno = 64 (0x40), region = 44  ;;  %vm268_vm0 = vcmask (!%p2705_p6), 261120   ;;  %v2193_v0 = vmov (!%p2705_p6), 0.0  }
  0x3a   : > { %s1575_s9 = sshll.u32 %s259_s11, 3  ;;  %269 = vst.msk [vmem:[#allocation3] sm:$0xff] (!%p2705_p6), %vm268_vm0, %v2193_v0  ;;  %270 = vst.msk [vmem:[#allocation4] sm:$0xff] (!%p2705_p6), %vm268_vm0, %v2193_v0 }
  0x3b   : > { %s2339_s17 = scalar_lea.vmem %s2687_s0, %s1575_s9 }
  0x40 PF: > { %v271_v1 = vld [vmem:[%s2339_s17] sm:$0xff]  ;;  %v2194_v3 = vmov 0   ;;  %v330_v4 = vld [vmem:[%s2688_s1 + $0x8] sm:$0xff]  ;;  %v331_v5 = vld [vmem:[%s2688_s1 + $0x10] sm:$0xff]  ;;  %v2195_v7 = vmov 0.0|0.0   ;;  %vm2196_vm1 = vmmov 0   ;;  %v279_v37 = vlaneseq }
  0x41   : > { %v329_v2 = vld [vmem:[%s2688_s1] sm:$0xff]  ;;  %1988 = vset.pattern.permute.xlu0 %v2194_v3  ;;  %v332_v6 = vld [vmem:[%s2688_s1 + $0x18] sm:$0xff]  ;;  %1863 = vmatprep.subr.bf16.mxu1 %v2195_v7  ;;  %v272_v10 = vld [vmem:[%s2339_s17 + $0x8] sm:$0xff]  ;;  %v2197_v21 = vmov 0.0   ;;  %vm467_vm2 = vcmask 261120   ;;  %v2198_v40 = vmov 1.0   ;;  %v571_v62 = vstv %s2330_s14 }
  0x42   : > { %282 = vperm.xlu0 %1988, %v271_v1   ;;  %v1831_v8 = vpack.c.bf16 %v330_v4, %v329_v2  ;;  %v1835_v9 = vpack.c.bf16 %v332_v6, %v331_v5  ;;  %1989 = vset.pattern.permute.xlu1 %v2194_v3  ;;  %v333_v11 = vld [vmem:[%s2688_s1 + $0x20] sm:$0xff]  ;;  %v334_v12 = vld [vmem:[%s2688_s1 + $0x28] sm:$0xff]  ;;  %v458_v13 = vld [vmem:[#allocation5] sm:$0xff]  ;;  %v2417_v38 = vand.u32 127, %v279_v37  ;;  %s2199_s16 = smov 64   ;;  %s2200_s19 = smov 32  }
  0x43   : > { %v459_v14 = vld [vmem:[#allocation5 + $0x8] sm:$0xff]  ;;  %v1839_v15 = vpack.c.bf16 %v334_v12, %v333_v11  ;;  %v460_v17 = vld [vmem:[#allocation5 + $0x10] sm:$0xff]  ;;  %v335_v18 = vld [vmem:[%s2688_s1 + $0x30] sm:$0xff]  ;;  %1751 = vmatprep.mubr.msk.f32.mxu1 %vm2196_vm1, %v2197_v21  ;;  %s2201_s20 = smov 96   ;;  %s690_s29 = sadd.s32 1, %s2330_s14 }
  0x44   : > { %1832 = vmatprep.subr.bf16.mxu0 %v1831_v8  ;;  %v2366_v16 = vpack.c.bf16 %v459_v14, %v458_v13  ;;  %v336_v19 = vld [vmem:[%s2688_s1 + $0x38] sm:$0xff]  ;;  %v461_v20 = vld [vmem:[#allocation5 + $0x18] sm:$0xff]  ;;  %v337_v24 = vld [vmem:[%s2688_s1 + $0x40] sm:$0xff]  ;;  %s811_s10 = sadd.s32 2, %s2330_s14  ;;  %s932_s12 = sadd.s32 3, %s2330_s14 }
  0x45   : > { %1834 = vmatpush3.bf16.msra.mxu0 %v1831_v8  ;;  %v2377_v22 = vpack.c.bf16 %v461_v20, %v460_v17  ;;  %v1843_v23 = vpack.c.bf16 %v336_v19, %v335_v18  ;;  %v338_v25 = vld [vmem:[%s2688_s1 + $0x48] sm:$0xff]  ;;  %v339_v28 = vld [vmem:[%s2688_s1 + $0x50] sm:$0xff]  ;;  %v340_v29 = vld [vmem:[%s2688_s1 + $0x58] sm:$0xff]  ;;  %s1053_s11 = sadd.s32 4, %s2330_s14  ;;  %s1295_s9 = sadd.s32 6, %s2330_s14 }
  0x46   : > { %285 = vperm.xlu0 %1988, %v272_v10   ;;  %1836 = vmatprep.subr.bf16.mxu0 %v1835_v9  ;;  %v2387_v26 = vld [vmem:[#allocation3] sm:$0xff]  ;;  %v1847_v27 = vpack.c.bf16 %v338_v25, %v337_v24  ;;  %v1851_v30 = vpack.c.bf16 %v340_v29, %v339_v28  ;;  %v341_v31 = vld [vmem:[%s2688_s1 + $0x60] sm:$0xff]  ;;  %v343_v34 = vld [vmem:[%s2688_s1 + $0x70] sm:$0xff]  ;;  %s1416_s15 = sadd.s32 7, %s2330_s14  ;;  %p2706_p10 = scmp.eq.s32.totalorder %s2263_s25, 1 }
  0x47   : > { %1865 = vmatpush3.bf16.msra.mxu1 %v2366_v16  ;;  %v342_v32 = vld [vmem:[%s2688_s1 + $0x68] sm:$0xff]  ;;  %v344_v35 = vld [vmem:[%s2688_s1 + $0x78] sm:$0xff]  ;;  %v465_v53 = vld [vmem:[#allocation4] sm:$0xff] }
  0x48   : > { %1866 = vmatprep.subr.bf16.mxu1 %v2195_v7  ;;  %v1855_v33 = vpack.c.bf16 %v342_v32, %v341_v31  ;;  %v1859_v36 = vpack.c.bf16 %v344_v35, %v343_v34  ;;  %v2435_v61 = vld [vmem:[%s2690_s3] sm:$0xff]  ;;  %v273_v19 = vld [vmem:[%s2339_s17 + $0x10] sm:$0xff]  ;;  %v691_v31 = vstv %s690_s29 }
  0x49   : > { %1838 = vmatpush3.bf16.msra.mxu0 %v1835_v9  ;;  %vm572_vm5 = vcmp.lt.s32.totalorder %v571_v62, %v2435_v61  ;;  %vm692_vm8 = vcmp.lt.s32.totalorder %v691_v31, %v2435_v61 }
  0x4a   : > { %1840 = vmatprep.subr.bf16.mxu0 %v1839_v15 }
  0x4b   : > { %1868 = vmatpush3.bf16.msra.mxu1 %v2377_v22 }
  0x4c   : > { %1869 = vmatprep.subr.bf16.mxu1 %v2195_v7 }
  0x4d   : > { %1842 = vmatpush3.bf16.msra.mxu0 %v1839_v15 }
  0x4e   : > { %1844 = vmatprep.subr.bf16.mxu0 %v1843_v23  ;;  %1752 = vmatmul.mubr.msk.f32.vlgmr.msra.gmra.mrb[0].mxu1 %vm467_vm2, %v2387_v26 }
  0x4f   : > { %1871 = vmatpush3.bf16.msra.mxu1 %v2366_v16  ;;  %1762 = vmatprep.mubr.msk.f32.mxu1 %vm2196_vm1, %v2197_v21 }
  0x50   : > { %1872 = vmatprep.subr.bf16.mxu1 %v2195_v7 }
  0x51   : > { %1846 = vmatpush3.bf16.msra.mxu0 %v1843_v23 }
  0x52   : > { %1848 = vmatprep.subr.bf16.mxu0 %v1847_v27 }
  0x53   : > { %1874 = vmatpush3.bf16.msra.mxu1 %v2377_v22 }
  0x54   : > { %1875 = vmatprep.subr.bf16.mxu1 %v2195_v7 }
  0x55   : > { %1850 = vmatpush3.bf16.msra.mxu0 %v1847_v27  ;;  %v274_v27 = vld [vmem:[%s2339_s17 + $0x18] sm:$0xff] }
  0x56   : > { %1852 = vmatprep.subr.bf16.mxu0 %v1851_v30 }
  0x59   : > { %1854 = vmatpush3.bf16.msra.mxu0 %v1851_v30 }
  0x5a   : > { %1856 = vmatprep.subr.bf16.mxu0 %v1855_v33 }
  0x5d   : > { %1858 = vmatpush3.bf16.msra.mxu0 %v1855_v33 }
  0x5e   : > { %1860 = vmatprep.subr.bf16.mxu0 %v1859_v36 }
  0x61   : > { %1862 = vmatpush3.bf16.msra.mxu0 %v1859_v36 }
  0x62   : > { %1893 = vmatprep.subr.bf16.mxu0 %v2195_v7 }
  0xc1   : > { %v283_v39 = vpop.permute.xlu0 %282 }
  0xc2   : > { %vm305_vm3 = vcmp.eq.s32.totalorder %v2417_v38, %v283_v39 }
  0xc3   : > { %1731 = vmatprep.mubr.msk.f32.mxu0 %vm305_vm3, %v2198_v40 }
  0xc5   : > { %v286_v41 = vpop.permute.xlu0 %285 }
  0xc6   : > { %vm306_vm4 = vcmp.eq.s32.totalorder %v2417_v38, %v286_v41 }
  0xc7   : > { %1732 = vmatmul.mubr.msk.f32.vlgmr.msra.gmra.mrb[0].mxu0 %vm306_vm4, %v2198_v40 }
  0xc8   : > { %1895 = vmatpush3.bf16.msra.mxu0 %v2366_v16 }
  0xc9   : > { %1896 = vmatprep.subr.bf16.mxu0 %v2195_v7 }
  0xcc   : > { %1898 = vmatpush3.bf16.msra.mxu0 %v2377_v22 }
  0xcd   : > { %1905 = vmatprep.subr.bf16.mxu0 %v2195_v7 }
 0x121   : > { %v537_v42 = vpop.f32.mrb[0].mxu1 }
 0x122   : > { %v1753_v43 = vpop.f32.mrb[1].mxu1 }
 0x19a   : > { %v1733_v44 = vpop.f32.mrb[0].mxu0 }
 0x19b   : > { %v411_v45 = vpop.f32.mrb[1].mxu0 }
 0x19c   : > { %v541_v46 = vadd.f32 %v537_v42, %v411_v45 }
 0x19e   : > { %v1595_v47 = vmul.f32 -1.442695, %v541_v46 }
 0x1a0   : > { %1990 = vpow2.f32 %v1595_v47 }
 0x1aa   : > { %v1991_v48 = vpop.eup %1990 }
 0x1ab   : > { %v545_v49 = vadd.f32 1.0, %v1991_v48 }
 0x1ad   : > { %1992 = vrcp.f32 %v545_v49 }
 0x1b7   : > { %v1993_v50 = vpop.eup %1992 }
 0x1b8   : > { %v548_v51 = vmul.f32 2.0, %v1993_v50 }
 0x1ba   : > { %v1596_v52 = vadd.f32 -1.0, %v548_v51 }
 0x1bc   : > { %556 = vrot.lane.b32.xlu1 %v1596_v52, %s2199_s16 }
 0x1c0   : > { %551 = vrot.lane.b32.xlu1 %v465_v53, %s2200_s19 }
 0x22e   : > { %v557_v54 = vpop.permute.xlu1 %556 }
 0x22f   : > { %v559_v55 = vmul.f32 %v1993_v50, %v557_v54 }
 0x231   : > { %561 = vrot.lane.b32.xlu0 %v559_v55, %s2200_s19 }
 0x232   : > { %v552_v56 = vpop.permute.xlu1 %551 }
 0x233   : > { %v554_v57 = vmul.f32 %v1993_v50, %v552_v56 }
 0x2a3   : > { %v562_v58 = vpop.permute.xlu0 %561 }
 0x2a4   : > { %v564_v59 = vadd.f32 %v562_v58, %v554_v57  ;;  %v812_v58 = vstv %s811_s10 }
 0x2a5   : > { %vm813_vm9 = vcmp.lt.s32.totalorder %v812_v58, %v2435_v61 }
 0x2a6   : > { %1994 = vtanh.f32 %v564_v59 }
 0x2b0   : > { %v1995_v60 = vpop.eup %1994 }
 0x2b1   : > { %567 = vrot.lane.b32.xlu1 %v1995_v60, %s2199_s16 }
 0x2b5   : > { %574 = vrot.lane.b32.xlu1 %v564_v59, %s2201_s20 }
 0x323   : > { %v568_v63 = vpop.permute.xlu1 %567 }
 0x324   : > { %v570_v0 = vmul.f32 %v1993_v50, %v568_v63 }
 0x326   : > { %579 = vrot.lane.b32.xlu0 %v570_v0, %s2200_s19 }
 0x327   : > { %v575_v1 = vpop.permute.xlu1 %574 }
 0x328   : > { %v577_v2 = vsel %vm572_vm5, %v575_v1, %v465_v53 }
 0x329   : > { %670 = vrot.lane.b32.xlu1 %v577_v2, %s2200_s19 }
 0x398   : > { %v580_v3 = vpop.permute.xlu0 %579 }
 0x399   : > { %v582_v4 = vsel %vm572_vm5, %v580_v3, %v2387_v26  ;;  %v583_v5 = vsel %vm572_vm5, %v580_v3, 0.0 }
 0x39a   : > { %584 = vst.msk [vmem:[%s2341_s18] sm:$0xff] %vm467_vm2, %v583_v5  ;;  %1763 = vmatmul.mubr.msk.f32.vlgmr.msra.gmra.mrb[2].mxu1 %vm467_vm2, %v582_v4 }
 0x39b   : > { %1877 = vmatpush3.bf16.msra.mxu1 %v2366_v16  ;;  %1773 = vmatprep.mubr.msk.f32.mxu1 %vm2196_vm1, %v2197_v21  ;;  %v671_v20 = vpop.permute.xlu1 %670 }
 0x39c   : > { %1878 = vmatprep.subr.bf16.mxu1 %v2195_v7 }
 0x39f   : > { %1880 = vmatpush3.bf16.msra.mxu1 %v2377_v22 }
 0x3a0   : > { %1881 = vmatprep.subr.bf16.mxu1 %v2195_v7 }
 0x46d   : > { %v656_v6 = vpop.f32.mrb[2].mxu1 }
 0x46e   : > { %v660_v8 = vadd.f32 %v1733_v44, %v656_v6  ;;  %v1764_v9 = vpop.f32.mrb[3].mxu1 }
 0x470   : > { %v1598_v10 = vmul.f32 -1.442695, %v660_v8 }
 0x472   : > { %1996 = vpow2.f32 %v1598_v10 }
 0x47c   : > { %v1997_v11 = vpop.eup %1996 }
 0x47d   : > { %v664_v12 = vadd.f32 1.0, %v1997_v11 }
 0x47f   : > { %1998 = vrcp.f32 %v664_v12 }
 0x489   : > { %v1999_v13 = vpop.eup %1998 }
 0x48a   : > { %v667_v14 = vmul.f32 2.0, %v1999_v13  ;;  %v673_v23 = vmul.f32 %v1999_v13, %v671_v20 }
 0x48c   : > { %v1599_v15 = vadd.f32 -1.0, %v667_v14 }
 0x48e   : > { %675 = vrot.lane.b32.xlu0 %v1599_v15, %s2199_s16  ;;  %v275_v15 = vld [vmem:[%s2339_s17 + $0x20] sm:$0xff] }
 0x500   : > { %v676_v17 = vpop.permute.xlu0 %675 }
 0x501   : > { %v678_v18 = vmul.f32 %v1999_v13, %v676_v17 }
 0x503   : > { %680 = vrot.lane.b32.xlu0 %v678_v18, %s2200_s19 }
 0x507   : > { %288 = vperm.xlu0 %1988, %v273_v19  }
 0x575   : > { %v681_v24 = vpop.permute.xlu0 %680 }
 0x576   : > { %v683_v25 = vadd.f32 %v681_v24, %v673_v23  ;;  %v276_v24 = vld [vmem:[%s2339_s17 + $0x28] sm:$0xff] }
 0x578   : > { %2000 = vtanh.f32 %v683_v25 }
 0x582   : > { %v2001_v26 = vpop.eup %2000 }
 0x583   : > { %686 = vrot.lane.b32.xlu1 %v2001_v26, %s2199_s16 }
 0x586   : > { %v289_v28 = vpop.permute.xlu0 %288 }
 0x587   : > { %vm307_vm6 = vcmp.eq.s32.totalorder %v2417_v38, %v289_v28  ;;  %291 = vperm.xlu1 %1989, %v274_v27   ;;  %v933_v28 = vstv %s932_s12 }
 0x588   : > { %1734 = vmatprep.mubr.msk.f32.mxu0 %vm307_vm6, %v2198_v40  ;;  %vm934_vm12 = vcmp.lt.s32.totalorder %v933_v28, %v2435_v61 }
 0x58b   : > { %694 = vrot.lane.b32.xlu1 %v683_v25, %s2201_s20 }
 0x5f5   : > { %v687_v29 = vpop.permute.xlu1 %686 }
 0x5f6   : > { %v689_v30 = vmul.f32 %v1999_v13, %v687_v29 }
 0x5f8   : > { %699 = vrot.lane.b32.xlu0 %v689_v30, %s2200_s19 }
 0x606   : > { %v292_v32 = vpop.permute.xlu1 %291 }
 0x607   : > { %vm308_vm7 = vcmp.eq.s32.totalorder %v2417_v38, %v292_v32 }
 0x608   : > { %1735 = vmatmul.mubr.msk.f32.gmra.mrb[2].mxu0 %vm308_vm7, %v2198_v40 }
 0x60a   : > { %v695_v33 = vpop.permute.xlu1 %694 }
 0x60b   : > { %v697_v34 = vsel %vm692_vm8, %v695_v33, %v577_v2 }
 0x60c   : > { %791 = vrot.lane.b32.xlu1 %v697_v34, %s2200_s19 }
 0x66a   : > { %v700_v35 = vpop.permute.xlu0 %699 }
 0x66b   : > { %v702_v36 = vsel %vm692_vm8, %v700_v35, %v582_v4  ;;  %v703_v37 = vsel %vm692_vm8, %v700_v35, 0.0 }
 0x66c   : > { %1600 = vst.msk [vmem:[%s2341_s18 + $0x8] sm:$0xff] %vm467_vm2, %v703_v37  ;;  %1774 = vmatmul.mubr.msk.f32.vlgmr.msra.gmra.mrb[4].mxu1 %vm467_vm2, %v702_v36 }
 0x66d   : > { %1883 = vmatpush3.bf16.msra.mxu1 %v2366_v16  ;;  %1784 = vmatprep.mubr.msk.f32.mxu1 %vm2196_vm1, %v2197_v21 }
 0x66e   : > { %1884 = vmatprep.subr.bf16.mxu1 %v2195_v7 }
 0x671   : > { %1886 = vmatpush3.bf16.msra.mxu1 %v2377_v22 }
 0x672   : > { %1887 = vmatprep.subr.bf16.mxu1 %v2195_v7 }
 0x67e   : > { %v792_v53 = vpop.permute.xlu1 %791 }
 0x6db   : > { %v1736_v39 = vpop.f32.mrb[2].mxu0 }
 0x6dc   : > { %v421_v41 = vpop.f32.mrb[3].mxu0 }
 0x73f   : > { %v777_v42 = vpop.f32.mrb[4].mxu1 }
 0x740   : > { %v781_v43 = vadd.f32 %v777_v42, %v421_v41  ;;  %v1775_v44 = vpop.f32.mrb[5].mxu1 }
 0x742   : > { %v1602_v45 = vmul.f32 -1.442695, %v781_v43 }
 0x744   : > { %2002 = vpow2.f32 %v1602_v45 }
 0x74e   : > { %v2003_v46 = vpop.eup %2002 }
 0x74f   : > { %v785_v47 = vadd.f32 1.0, %v2003_v46 }
 0x751   : > { %2004 = vrcp.f32 %v785_v47 }
 0x75b   : > { %v2005_v48 = vpop.eup %2004 }
 0x75c   : > { %v788_v49 = vmul.f32 2.0, %v2005_v48  ;;  %v794_v54 = vmul.f32 %v2005_v48, %v792_v53 }
 0x75e   : > { %v1603_v50 = vadd.f32 -1.0, %v788_v49 }
 0x760   : > { %796 = vrot.lane.b32.xlu0 %v1603_v50, %s2199_s16  ;;  %v277_v50 = vld [vmem:[%s2339_s17 + $0x30] sm:$0xff] }
 0x7d2   : > { %v797_v51 = vpop.permute.xlu0 %796 }
 0x7d3   : > { %v799_v52 = vmul.f32 %v2005_v48, %v797_v51 }
 0x7d5   : > { %801 = vrot.lane.b32.xlu0 %v799_v52, %s2200_s19 }
 0x847   : > { %v802_v55 = vpop.permute.xlu0 %801 }
 0x848   : > { %v804_v56 = vadd.f32 %v802_v55, %v794_v54 }
 0x84a   : > { %2006 = vtanh.f32 %v804_v56 }
 0x854   : > { %v2007_v57 = vpop.eup %2006 }
 0x855   : > { %807 = vrot.lane.b32.xlu1 %v2007_v57, %s2199_s16 }
 0x859   : > { %815 = vrot.lane.b32.xlu1 %v804_v56, %s2201_s20  ;;  %v278_v56 = vld [vmem:[%s2339_s17 + $0x38] sm:$0xff]  ;;  %s1174_s17 = sadd.s32 5, %s2330_s14  ;;  %s1450_s14 = sshll.u32 %s2341_s18, 4  ;;  %s2586_s14 = int_to_ptr.vmem [resolvable:$true] %s1450_s14 }
 0x8c7   : > { %v808_v59 = vpop.permute.xlu1 %807 }
 0x8c8   : > { %v810_v60 = vmul.f32 %v2005_v48, %v808_v59 }
 0x8ca   : > { %820 = vrot.lane.b32.xlu0 %v810_v60, %s2200_s19  ;;  %v1054_v60 = vstv %s1053_s11 }
 0x8cb   : > { %v816_v62 = vpop.permute.xlu1 %815  ;;  %vm1055_vm15 = vcmp.lt.s32.totalorder %v1054_v60, %v2435_v61 }
 0x8cc   : > { %v818_v63 = vsel %vm813_vm9, %v816_v62, %v697_v34 }
 0x8cd   : > { %912 = vrot.lane.b32.xlu1 %v818_v63, %s2200_s19 }
 0x93c   : > { %v821_v0 = vpop.permute.xlu0 %820 }
 0x93d   : > { %v823_v1 = vsel %vm813_vm9, %v821_v0, %v702_v36  ;;  %v824_v2 = vsel %vm813_vm9, %v821_v0, 0.0 }
 0x93e   : > { %1604 = vst.msk [vmem:[%s2341_s18 + $0x10] sm:$0xff] %vm467_vm2, %v824_v2  ;;  %1785 = vmatmul.mubr.msk.f32.vlgmr.msra.gmra.mrb[6].mxu1 %vm467_vm2, %v823_v1 }
 0x93f   : > { %1889 = vmatpush3.bf16.msra.mxu1 %v2366_v16  ;;  %1795 = vmatprep.mubr.msk.f32.mxu1 %vm2196_vm1, %v2197_v21  ;;  %v913_v17 = vpop.permute.xlu1 %912 }
 0x940   : > { %1890 = vmatprep.subr.bf16.mxu1 %v2195_v7 }
 0x943   : > { %1892 = vmatpush3.bf16.msra.mxu1 %v2377_v22 }
 0x944   : > { %1899 = vmatprep.subr.bf16.mxu1 %v2195_v7 }
 0xa11   : > { %v898_v3 = vpop.f32.mrb[6].mxu1 }
 0xa12   : > { %v902_v4 = vadd.f32 %v1736_v39, %v898_v3  ;;  %v1786_v5 = vpop.f32.mrb[7].mxu1 }
 0xa14   : > { %v1606_v6 = vmul.f32 -1.442695, %v902_v4 }
 0xa16   : > { %2008 = vpow2.f32 %v1606_v6 }
 0xa20   : > { %v2009_v8 = vpop.eup %2008 }
 0xa21   : > { %v906_v9 = vadd.f32 1.0, %v2009_v8 }
 0xa23   : > { %2010 = vrcp.f32 %v906_v9 }
 0xa2d   : > { %v2011_v10 = vpop.eup %2010 }
 0xa2e   : > { %v909_v11 = vmul.f32 2.0, %v2011_v10  ;;  %v915_v18 = vmul.f32 %v2011_v10, %v913_v17 }
 0xa30   : > { %v1607_v12 = vadd.f32 -1.0, %v909_v11 }
 0xa32   : > { %917 = vrot.lane.b32.xlu0 %v1607_v12, %s2199_s16 }
 0xaa4   : > { %v918_v13 = vpop.permute.xlu0 %917 }
 0xaa5   : > { %v920_v14 = vmul.f32 %v2011_v10, %v918_v13 }
 0xaa7   : > { %922 = vrot.lane.b32.xlu0 %v920_v14, %s2200_s19 }
 0xaab   : > { %294 = vperm.xlu0 %1988, %v275_v15  }
 0xb19   : > { %v923_v19 = vpop.permute.xlu0 %922 }
 0xb1a   : > { %v925_v20 = vadd.f32 %v923_v19, %v915_v18  ;;  %v1175_v18 = vstv %s1174_s17 }
 0xb1b   : > { %vm1176_vm0 = vcmp.lt.s32.totalorder %v1175_v18, %v2435_v61 }
 0xb1c   : > { %2012 = vtanh.f32 %v925_v20 }
 0xb26   : > { %v2013_v23 = vpop.eup %2012 }
 0xb27   : > { %928 = vrot.lane.b32.xlu1 %v2013_v23, %s2199_s16 }
 0xb2a   : > { %v295_v25 = vpop.permute.xlu0 %294 }
 0xb2b   : > { %vm309_vm10 = vcmp.eq.s32.totalorder %v2417_v38, %v295_v25  ;;  %297 = vperm.xlu1 %1989, %v276_v24  }
 0xb2c   : > { %1737 = vmatprep.mubr.msk.f32.mxu0 %vm309_vm10, %v2198_v40 }
 0xb2f   : > { %936 = vrot.lane.b32.xlu1 %v925_v20, %s2201_s20 }
 0xb99   : > { %v929_v26 = vpop.permute.xlu1 %928 }
 0xb9a   : > { %v931_v27 = vmul.f32 %v2011_v10, %v929_v26 }
 0xb9c   : > { %941 = vrot.lane.b32.xlu0 %v931_v27, %s2200_s19 }
 0xbaa   : > { %v298_v29 = vpop.permute.xlu1 %297 }
 0xbab   : > { %vm310_vm11 = vcmp.eq.s32.totalorder %v2417_v38, %v298_v29 }
 0xbac   : > { %1738 = vmatmul.mubr.msk.f32.gmra.mrb[4].mxu0 %vm310_vm11, %v2198_v40 }
 0xbae   : > { %v937_v30 = vpop.permute.xlu1 %936 }
 0xbaf   : > { %v939_v31 = vsel %vm934_vm12, %v937_v30, %v818_v63 }
 0xbb0   : > { %1033 = vrot.lane.b32.xlu1 %v939_v31, %s2200_s19 }
 0xc0e   : > { %v942_v32 = vpop.permute.xlu0 %941 }
 0xc0f   : > { %v944_v33 = vsel %vm934_vm12, %v942_v32, %v823_v1  ;;  %v945_v34 = vsel %vm934_vm12, %v942_v32, 0.0 }
 0xc10   : > { %1608 = vst.msk [vmem:[%s2341_s18 + $0x18] sm:$0xff] %vm467_vm2, %v945_v34  ;;  %1796 = vmatmul.mubr.msk.f32.vlgmr.msra.gmra.mrb[8].mxu1 %vm467_vm2, %v944_v33 }
 0xc11   : > { %1901 = vmatpush3.bf16.msra.mxu1 %v2366_v16  ;;  %1817 = vmatprep.mubr.msk.f32.mxu1 %vm2196_vm1, %v2197_v21 }
 0xc12   : > { %1902 = vmatprep.subr.bf16.mxu1 %v2195_v7 }
 0xc15   : > { %1904 = vmatpush3.bf16.msra.mxu1 %v2377_v22 }
 0xc22   : > { %v1034_v51 = vpop.permute.xlu1 %1033 }
 0xc7f   : > { %v1739_v35 = vpop.f32.mrb[4].mxu0 }
 0xc80   : > { %v431_v36 = vpop.f32.mrb[5].mxu0 }
 0xce3   : > { %v1019_v37 = vpop.f32.mrb[8].mxu1 }
 0xce4   : > { %v1023_v39 = vadd.f32 %v1019_v37, %v431_v36  ;;  %v1797_v41 = vpop.f32.mrb[9].mxu1 }
 0xce6   : > { %v1610_v42 = vmul.f32 -1.442695, %v1023_v39 }
 0xce8   : > { %2014 = vpow2.f32 %v1610_v42 }
 0xcf2   : > { %v2015_v43 = vpop.eup %2014 }
 0xcf3   : > { %v1027_v44 = vadd.f32 1.0, %v2015_v43 }
 0xcf5   : > { %2016 = vrcp.f32 %v1027_v44 }
 0xcff   : > { %v2017_v45 = vpop.eup %2016 }
 0xd00   : > { %v1030_v46 = vmul.f32 2.0, %v2017_v45  ;;  %v1036_v52 = vmul.f32 %v2017_v45, %v1034_v51 }
 0xd02   : > { %v1611_v47 = vadd.f32 -1.0, %v1030_v46  ;;  %v1296_v46 = vstv %s1295_s9 }
 0xd04   : > { %1038 = vrot.lane.b32.xlu0 %v1611_v47, %s2199_s16 }
 0xd76   : > { %v1039_v48 = vpop.permute.xlu0 %1038 }
 0xd77   : > { %v1041_v49 = vmul.f32 %v2017_v45, %v1039_v48 }
 0xd79   : > { %1043 = vrot.lane.b32.xlu0 %v1041_v49, %s2200_s19 }
 0xd7d   : > { %300 = vperm.xlu0 %1988, %v277_v50  }
 0xdeb   : > { %v1044_v53 = vpop.permute.xlu0 %1043 }
 0xdec   : > { %v1046_v54 = vadd.f32 %v1044_v53, %v1036_v52 }
 0xdee   : > { %2018 = vtanh.f32 %v1046_v54 }
 0xdf8   : > { %v2019_v55 = vpop.eup %2018 }
 0xdf9   : > { %1049 = vrot.lane.b32.xlu1 %v2019_v55, %s2199_s16 }
 0xdfc   : > { %v301_v57 = vpop.permute.xlu0 %300 }
 0xdfd   : > { %vm311_vm13 = vcmp.eq.s32.totalorder %v2417_v38, %v301_v57  ;;  %303 = vperm.xlu1 %1989, %v278_v56  }
 0xdfe   : > { %1740 = vmatprep.mubr.msk.f32.mxu0 %vm311_vm13, %v2198_v40 }
 0xe01   : > { %1057 = vrot.lane.b32.xlu1 %v1046_v54, %s2201_s20 }
 0xe6b   : > { %v1050_v58 = vpop.permute.xlu1 %1049 }
 0xe6c   : > { %v1052_v59 = vmul.f32 %v2017_v45, %v1050_v58 }
 0xe6e   : > { %1062 = vrot.lane.b32.xlu0 %v1052_v59, %s2200_s19 }
 0xe7c   : > { %v304_v62 = vpop.permute.xlu1 %303 }
 0xe7d   : > { %vm312_vm14 = vcmp.eq.s32.totalorder %v2417_v38, %v304_v62 }
 0xe7e   : > { %1741 = vmatmul.mubr.msk.f32.gmra.mrb[6].mxu0 %vm312_vm14, %v2198_v40 }
 0xe7f   : > { %1806 = vmatprep.mubr.msk.f32.mxu0 %vm2196_vm1, %v2197_v21 }
 0xe80   : > { %v1058_v63 = vpop.permute.xlu1 %1057 }
 0xe81   : > { %v1060_v0 = vsel %vm1055_vm15, %v1058_v63, %v939_v31 }
 0xe82   : > { %1154 = vrot.lane.b32.xlu1 %v1060_v0, %s2200_s19 }
 0xee0   : > { %v1063_v1 = vpop.permute.xlu0 %1062 }
 0xee1   : > { %v1065_v2 = vsel %vm1055_vm15, %v1063_v1, %v944_v33  ;;  %v1066_v3 = vsel %vm1055_vm15, %v1063_v1, 0.0 }
 0xee2   : > { %1612 = vst.msk [vmem:[%s2341_s18 + $0x20] sm:$0xff] %vm467_vm2, %v1066_v3  ;;  %1807 = vmatmul.mubr.msk.f32.vlgmr.msra.gmra.mrb[8].mxu0 %vm467_vm2, %v1065_v2 }
 0xee3   : > { %1907 = vmatpush3.bf16.msra.mxu0 %v2366_v16  ;;  %1828 = vmatprep.mubr.msk.f32.mxu0 %vm2196_vm1, %v2197_v21  ;;  %vm1297_vm1 = vcmp.lt.s32.totalorder %v1296_v46, %v2435_v61 }
 0xee4   : > { %1908 = vmatprep.subr.bf16.mxu0 %v2195_v7 }
 0xee7   : > { %1910 = vmatpush3.bf16.msra.mxu0 %v2377_v22 }
 0xef4   : > { %v1155_v22 = vpop.permute.xlu1 %1154 }
 0xf51   : > { %v2537_v38 = vpop.f32.mrb[6].mxu0 }
 0xf52   : > { %v441_v40 = vpop.f32.mrb[7].mxu0 }
 0xfb5   : > { %v1140_v4 = vpop.f32.mrb[8].mxu0 }
 0xfb6   : > { %v1144_v5 = vadd.f32 %v1739_v35, %v1140_v4  ;;  %v1808_v6 = vpop.f32.mrb[9].mxu0 }
 0xfb8   : > { %v1614_v8 = vmul.f32 -1.442695, %v1144_v5  ;;  %v1417_v5 = vstv %s1416_s15 }
 0xfb9   : > { %vm1418_vm3 = vcmp.lt.s32.totalorder %v1417_v5, %v2435_v61 }
 0xfba   : > { %2020 = vpow2.f32 %v1614_v8 }
 0xfc4   : > { %v2021_v9 = vpop.eup %2020 }
 0xfc5   : > { %v1148_v10 = vadd.f32 1.0, %v2021_v9 }
 0xfc7   : > { %2022 = vrcp.f32 %v1148_v10 }
 0xfd1   : > { %v2023_v16 = vpop.eup %2022 }
 0xfd2   : > { %v1151_v11 = vmul.f32 2.0, %v2023_v16  ;;  %v1157_v13 = vmul.f32 %v2023_v16, %v1155_v22 }
 0xfd4   : > { %v1615_v12 = vadd.f32 -1.0, %v1151_v11 }
 0xfd6   : > { %1159 = vrot.lane.b32.xlu0 %v1615_v12, %s2199_s16 }
0x1048   : > { %v1160_v7 = vpop.permute.xlu0 %1159 }
0x1049   : > { %v1162_v21 = vmul.f32 %v2023_v16, %v1160_v7 }
0x104b   : > { %1164 = vrot.lane.b32.xlu0 %v1162_v21, %s2200_s19 }
0x10bd   : > { %v1165_v14 = vpop.permute.xlu0 %1164 }
0x10be   : > { %v1167_v15 = vadd.f32 %v1165_v14, %v1157_v13 }
0x10c0   : > { %2024 = vtanh.f32 %v1167_v15 }
0x10ca   : > { %v2025_v17 = vpop.eup %2024 }
0x10cb   : > { %1170 = vrot.lane.b32.xlu1 %v2025_v17, %s2199_s16 }
0x10cf   : > { %1178 = vrot.lane.b32.xlu1 %v1167_v15, %s2201_s20 }
0x113d   : > { %v1171_v19 = vpop.permute.xlu1 %1170 }
0x113e   : > { %v1173_v20 = vmul.f32 %v2023_v16, %v1171_v19 }
0x1140   : > { %1183 = vrot.lane.b32.xlu0 %v1173_v20, %s2200_s19 }
0x1141   : > { %v1179_v23 = vpop.permute.xlu1 %1178 }
0x1142   : > { %v1181_v24 = vsel %vm1176_vm0, %v1179_v23, %v1060_v0 }
0x1143   : > { %1275 = vrot.lane.b32.xlu1 %v1181_v24, %s2200_s19 }
0x11b2   : > { %v1184_v25 = vpop.permute.xlu0 %1183 }
0x11b3   : > { %v1186_v26 = vsel %vm1176_vm0, %v1184_v25, %v1065_v2  ;;  %v1187_v27 = vsel %vm1176_vm0, %v1184_v25, 0.0 }
0x11b4   : > { %1616 = vst.msk [vmem:[%s2341_s18 + $0x28] sm:$0xff] %vm467_vm2, %v1187_v27  ;;  %1818 = vmatmul.mubr.msk.f32.vlgmr.msra.gmra.mrb[10].mxu1 %vm467_vm2, %v1186_v26 }
0x11b5   : > { %v1276_v41 = vpop.permute.xlu1 %1275 }
0x1287   : > { %v1261_v28 = vpop.f32.mrb[10].mxu1 }
0x1288   : > { %v1265_v29 = vadd.f32 %v1261_v28, %v441_v40  ;;  %v1819_v30 = vpop.f32.mrb[11].mxu1 }
0x128a   : > { %v1618_v31 = vmul.f32 -1.442695, %v1265_v29 }
0x128c   : > { %2026 = vpow2.f32 %v1618_v31 }
0x1296   : > { %v2027_v32 = vpop.eup %2026 }
0x1297   : > { %v1269_v33 = vadd.f32 1.0, %v2027_v32 }
0x1299   : > { %2028 = vrcp.f32 %v1269_v33 }
0x12a3   : > { %v2029_v34 = vpop.eup %2028 }
0x12a4   : > { %v1272_v35 = vmul.f32 2.0, %v2029_v34  ;;  %v1278_v42 = vmul.f32 %v2029_v34, %v1276_v41 }
0x12a6   : > { %v1619_v36 = vadd.f32 -1.0, %v1272_v35 }
0x12a8   : > { %1280 = vrot.lane.b32.xlu0 %v1619_v36, %s2199_s16 }
0x131a   : > { %v1281_v37 = vpop.permute.xlu0 %1280 }
0x131b   : > { %v1283_v39 = vmul.f32 %v2029_v34, %v1281_v37 }
0x131d   : > { %1285 = vrot.lane.b32.xlu0 %v1283_v39, %s2200_s19 }
0x138f   : > { %v1286_v43 = vpop.permute.xlu0 %1285 }
0x1390   : > { %v1288_v44 = vadd.f32 %v1286_v43, %v1278_v42 }
0x1392   : > { %2030 = vtanh.f32 %v1288_v44 }
0x139c   : > { %v2031_v45 = vpop.eup %2030 }
0x139d   : > { %1291 = vrot.lane.b32.xlu1 %v2031_v45, %s2199_s16 }
0x13a1   : > { %1299 = vrot.lane.b32.xlu1 %v1288_v44, %s2201_s20 }
0x140f   : > { %v1292_v47 = vpop.permute.xlu1 %1291 }
0x1410   : > { %v1294_v48 = vmul.f32 %v2029_v34, %v1292_v47 }
0x1412   : > { %1304 = vrot.lane.b32.xlu0 %v1294_v48, %s2200_s19 }
0x1413   : > { %v1300_v49 = vpop.permute.xlu1 %1299 }
0x1414   : > { %v1302_v50 = vsel %vm1297_vm1, %v1300_v49, %v1181_v24 }
0x1415   : > { %1396 = vrot.lane.b32.xlu1 %v1302_v50, %s2200_s19 }
0x1484   : > { %v1305_v51 = vpop.permute.xlu0 %1304 }
0x1485   : > { %v1307_v52 = vsel %vm1297_vm1, %v1305_v51, %v1186_v26  ;;  %v1308_v53 = vsel %vm1297_vm1, %v1305_v51, 0.0 }
0x1486   : > { %1620 = vst.msk [vmem:[%s2341_s18 + $0x30] sm:$0xff] %vm467_vm2, %v1308_v53  ;;  %1829 = vmatmul.mubr.msk.f32.vlgmr.msra.gmra.mrb[10].mxu0 %vm467_vm2, %v1307_v52 }
0x1487   : > { %v1397_v2 = vpop.permute.xlu1 %1396 }
0x1559   : > { %v1382_v54 = vpop.f32.mrb[10].mxu0 }
0x155a   : > { %v1386_v55 = vadd.f32 %v2537_v38, %v1382_v54  ;;  %v1830_v56 = vpop.f32.mrb[11].mxu0 }
0x155c   : > { %v1622_v57 = vmul.f32 -1.442695, %v1386_v55 }
0x155e   : > { %2032 = vpow2.f32 %v1622_v57 }
0x1568   : > { %v2033_v58 = vpop.eup %2032 }
0x1569   : > { %v1390_v59 = vadd.f32 1.0, %v2033_v58 }
0x156b   : > { %2034 = vrcp.f32 %v1390_v59 }
0x1575   : > { %v2035_v60 = vpop.eup %2034 }
0x1576   : > { %v1393_v62 = vmul.f32 2.0, %v2035_v60  ;;  %v1399_v3 = vmul.f32 %v2035_v60, %v1397_v2 }
0x1578   : > { %v1623_v63 = vadd.f32 -1.0, %v1393_v62 }
0x157a   : > { %1401 = vrot.lane.b32.xlu0 %v1623_v63, %s2199_s16 }
0x15ec   : > { %v1402_v0 = vpop.permute.xlu0 %1401 }
0x15ed   : > { %v1404_v1 = vmul.f32 %v2035_v60, %v1402_v0 }
0x15ef   : > { %1406 = vrot.lane.b32.xlu0 %v1404_v1, %s2200_s19 }
0x1661   : > { %v1407_v40 = vpop.permute.xlu0 %1406 }
0x1662   : > { %v1409_v38 = vadd.f32 %v1407_v40, %v1399_v3 }
0x1664   : > { %2036 = vtanh.f32 %v1409_v38 }
0x166e   : > { %v2037_v4 = vpop.eup %2036 }
0x166f   : > { %1412 = vrot.lane.b32.xlu1 %v2037_v4, %s2199_s16  ;;  %s2202_s16 = smov [#allocation9]  }
0x1670   : > { %s1464_s26 = sshll.u32 %s2202_s16, 4  ;;  %s2574_s26 = int_to_ptr.vmem [resolvable:$true] %s1464_s26 }
0x1671   : > { %s2066_s11 = scalar_lea.vmem %s2574_s26, 128  ;;  %p2073_p1 = scmp.lt.s32.totalorder %s2574_s26, %s2574_s26 }
0x1672   : > { %p2067_p9 = scmp.ne.s32.totalorder %s2574_s26, %s2066_s11  ;;  %p2074_p4 = scmp.lt.s32.totalorder %s2066_s11, %s2066_s11 }
0x1673   : > { %1420 = vrot.lane.b32.xlu1 %v1409_v38, %s2201_s20  ;;  %s1634_s20 = sshll.u32 %s2263_s25, 10 }
0x1674   : > { %s2580_s12 = scalar_lea.hbm %s2691_s4, %s1634_s20  ;;  %p2068_p11 = pnand %p2067_p9, %p2706_p10 }
0x1675   : > { %p2075_p7 = por %p2074_p4, %p2073_p1 }
0x1676   : > { %p2069_p13 = pneg %p2068_p11 }
0x1678   : > { %p2076_p8 = pnand %p2075_p7, %p2069_p13 }
0x16e1   : > { %v1413_v6 = vpop.permute.xlu1 %1412 }
0x16e2   : > { %v1415_v8 = vmul.f32 %v2035_v60, %v1413_v6 }
0x16e4   : > { %1425 = vrot.lane.b32.xlu0 %v1415_v8, %s2200_s19  ;;  %s2203_s19 = smov [#allocation11]  }
0x16e5   : > { %v1421_v9 = vpop.permute.xlu1 %1420  ;;  %s1475_s28 = sshll.u32 %s2203_s19, 4  ;;  %s2592_s28 = int_to_ptr.vmem [resolvable:$true] %s1475_s28 }
0x16e6   : > { %v1423_v10 = vsel %vm1418_vm3, %v1421_v9, %v1302_v50 }
0x16e7   : > { %1433 = vst.msk [vmem:[#allocation4] sm:$0xff] %vm467_vm2, %v1423_v10  ;;  %1435 = vst.msk [vmem:[#allocation11] sm:$0xff] %vm467_vm2, %v1423_v10 }
0x1756   : > { %v1426_v16 = vpop.permute.xlu0 %1425 }
0x1757   : > { %v1429_v11 = vsel %vm1418_vm3, %v1426_v16, 0.0  ;;  %v1428_v12 = vsel %vm1418_vm3, %v1426_v16, %v1307_v52 }
0x1758   : > { %1624 = vst.msk [vmem:[%s2341_s18 + $0x38] sm:$0xff] %vm467_vm2, %v1429_v11  ;;  %1432 = vst.msk [vmem:[#allocation3] sm:$0xff] %vm467_vm2, %v1428_v12 }
0x1759   : > { %1434 = vst.msk [vmem:[#allocation9] sm:$0xff] %vm467_vm2, %v1428_v12 }
0x175a   : > { %2079 = shalt.err (!%p2076_p8)
}
0x175b   : > { %s2080_s18 = scalar_lea.hbm %s2692_s5, 128  ;;  %p2707_p0 = pmov %p2706_p10 }
0x175c   : > { %p2081_p12 = scmp.ne.s32.totalorder %s2692_s5, %s2080_s18  ;;  %p2086_p5 = scmp.lt.u32.totalorder %s2080_s18, %s2692_s5 }
0x175e   : > { %p2082_p3 = pnand %p2081_p12, %p2707_p0 }
0x1760   : > { %p2083_p2 = pneg %p2082_p3 }
0x1762   : > { %p2088_p6 = pnand %p2086_p5, %p2083_p2 }
0x1764   : > { %2091 = shalt.err (!%p2088_p6)
}
0x1765   : > { %p2708_p9 = pmov %p2707_p0  ;;  %s2619_s11 = scalar_lea.sflag [#allocation7], %s250_s13 }
0x1766   : > { %s2092_s17 = scalar_lea.vmem %s2586_s14, 1024  ;;  %p2709_p11 = scmp.ne.s32.totalorder %s2698_s7, 0 }
0x1767   : > { %1917 = dma.vmem_to_hbm [thread:$0]  (%p2708_p9), %s2574_s26, 128, %s2692_s5, [#allocation10]  }
0x1768   : > { %p2093_p10 = scmp.ne.s32.totalorder %s2586_s14, %s2092_s17  ;;  %s2204_s9 = smov [#allocation8]  }
0x1769   : > { %s2096_s18 = sshll.u32 %s2204_s9, 4  ;;  %s2097_s18 = int_to_ptr.vmem [resolvable:$false] %s2096_s18 }
0x176a   : > { %p2094_p13 = pnand %p2093_p10, %p2709_p11  ;;  %s2098_s15 = scalar_lea.vmem %s2097_s18, 2048 }
0x176b   : > { %p2099_p4 = scmp.lt.s32.totalorder %s2586_s14, %s2097_s18  ;;  %p2100_p7 = scmp.lt.s32.totalorder %s2098_s15, %s2092_s17 }
0x176c   : > { %p2095_p1 = pneg %p2094_p13 }
0x176d   : > { %p2101_p8 = por %p2100_p7, %p2099_p4 }
0x176f   : > { %p2102_p12 = pnand %p2101_p8, %p2095_p1 }
0x1771   : > { %2105 = shalt.err (!%p2102_p12)
}
0x1772   : > { %s2106_s13 = scalar_lea.hbm %s2580_s12, 1024  ;;  %s2110_s20 = scalar_lea.hbm %s2691_s4, 2048 }
0x1773   : > { %p2107_p0 = scmp.ne.s32.totalorder %s2580_s12, %s2106_s13  ;;  %p2111_p5 = scmp.lt.u32.totalorder %s2580_s12, %s2691_s4 }
0x1774   : > { %p2112_p6 = scmp.lt.u32.totalorder %s2110_s20, %s2106_s13  ;;  %p2114_p10 = scmp.lt.u32.totalorder %s2106_s13, %s2580_s12 }
0x1775   : > { %p2108_p3 = pnand %p2107_p0, %p2709_p11 }
0x1776   : > { %p2113_p9 = por %p2112_p6, %p2111_p5 }
0x1777   : > { %p2109_p2 = pneg %p2108_p3 }
0x1778   : > { %p2115_p13 = por %p2114_p10, %p2113_p9 }
0x177a   : > { %p2116_p1 = pnand %p2115_p13, %p2109_p2 }
0x177c   : > { %2119 = shalt.err (!%p2116_p1)
}
0x177d   : > { %s2205_s10 = smov 128   ;;  %s2206_s17 = smov 8  }
0x177e   : > { %1915 = dma.vmem_to_hbm [thread:$0]  (%p2709_p11), %s2586_s14, 1024, %s2580_s12, %s2619_s11, %s2205_s10, %s2205_s10, %s2206_s17  }
0x177f   : > { %s2120_s9 = scalar_lea.vmem %s2592_s28, 128  ;;  %p2710_p7 = scmp.eq.s32.totalorder %s2263_s25, 1 }
0x1780   : > { %p2121_p4 = scmp.ne.s32.totalorder %s2592_s28, %s2120_s9  ;;  %p2127_p0 = scmp.lt.s32.totalorder %s2592_s28, %s2592_s28 }
0x1781   : > { %p2128_p3 = scmp.lt.s32.totalorder %s2120_s9, %s2120_s9 }
0x1782   : > { %p2122_p8 = pnand %p2121_p4, %p2710_p7 }
0x1783   : > { %p2129_p2 = por %p2128_p3, %p2127_p0 }
0x1784   : > { %p2123_p12 = pneg %p2122_p8 }
0x1786   : > { %p2130_p5 = pnand %p2129_p2, %p2123_p12 }
0x1788   : > { %2133 = shalt.err (!%p2130_p5)
}
0x1789   : > { %s2134_s13 = scalar_lea.hbm %s2693_s6, 128  ;;  %p2711_p6 = pmov %p2710_p7 }
0x178a   : > { %p2135_p11 = scmp.ne.s32.totalorder %s2693_s6, %s2134_s13  ;;  %p2140_p13 = scmp.lt.u32.totalorder %s2134_s13, %s2693_s6 }
0x178c   : > { %p2136_p9 = pnand %p2135_p11, %p2711_p6 }
0x178e   : > { %p2137_p10 = pneg %p2136_p9 }
0x1790   : > { %p2142_p1 = pnand %p2140_p13, %p2137_p10 }
0x1792   : > { %2145 = shalt.err (!%p2142_p1)
}
0x1793   : > { %p2712_p4 = pmov %p2711_p6 }
0x1795   : > { %1919 = dma.vmem_to_hbm [thread:$0]  (%p2712_p4), %s2592_s28, 128, %s2693_s6, [#allocation10]  }
0x1796   : > { %p2713_p7 = pmov %p2712_p4 }
0x1797   : > { %p2714_p8 = pmov %p2712_p4 }
0x1798   : > { %2167 = dma.done.wait (%p2713_p7), [#allocation10], 256  }
0x1799   : > { %2169 = vsyncadd (%p2714_p8), [#allocation10], 4294967040 }
0x179a PF: > { %p1939_p12 = scmp.ge.s32.totalorder %s2188_s24, 2  ;;  %s1495_s20 = sand.u32 1, %s2176_s21  }
0x179b   : > { %p2715_p0 = scmp.ne.s32.totalorder %s2699_s8, 0  ;;  %s1496_s19 = scalar_lea.sflag [#allocation7], %s1495_s20 }
0x179d   : > { %p1930_p3 = pnand %p1939_p12, %p2715_p0 }
0x179f   : > { %2171 = dma.done.wait (!%p1930_p3), %s1496_s19, 1024  }
0x17a0   : > { %2173 = vsyncadd (!%p1930_p3), %s1496_s19, 4294966272  ;;  %p19_p2 = scmp.ge.s32.totalorder %s2267_s27, 4   ;;  %s2716_s21 = smov %s2180_s22 }
0x17a1   : > { %s2717_s22 = smov %s2184_s23  ;;  %s2718_s23 = smov %s2278_s30 }
0x17a2   : > { %s2719_s24 = smov %s2267_s27  ;;  %21 = sbr.rel (!%p19_p2) target bundleno = 5 (0x5), region = 110 }
0x17a9   :  { %1501 = vsyncpa [#allocation6], 1 }
0x17aa   :  { %1503 = vsyncpa [#allocation6 + $0x1], 1 }
0x17ab   :  { %1504 = vsyncpa [#allocation7], 1 }
0x17ac   :  { %1506 = vsyncpa [#allocation7 + $0x1], 1 }
0x17ad   :  { %1507 = vsyncpa [#allocation10], 1 }

</bundles_post_ra>
